<compile_context>
chip_gen: v7x
topology: tpu7x:2x2x1
jax: 0.10.0
libtpu: 0.0.40
codegen_flags: <defaults>
</compile_context>

<pallas_src>
import functools

import jax
import jax.numpy as jnp
from jax.experimental import pallas as pl
from jax.experimental.pallas import tpu as pltpu


def _deconv_mm_kernel(x_ref, w_ref, b_ref, o_ref):
    # x_ref: (1, Cin, t)   w_ref: (Kout, Cin)   b_ref: (Kout, 1)   o_ref: (1, Kout, t)
    acc = jnp.dot(w_ref[...], x_ref[0], preferred_element_type=jnp.float32)  # (Kout, t)
    acc = acc + b_ref[...]                               # broadcast bias over lanes
    o_ref[0] = jnp.maximum(acc, 0.0).astype(o_ref.dtype)


def _pick_tile(dhw, cin, kout, in_itemsize, out_itemsize,
               vmem_budget=12 * 1024 * 1024, max_lanes=4096):
    """Pick a lane-dense spatial tile: the largest multiple of 128 dividing dhw
    (or the full extent) whose pipelined blocks fit the VMEM budget; pad only as
    a last resort."""
    # Bytes per lane column: double-buffered input block + double-buffered
    # output block + one f32 accumulator copy.
    per_lane = 2 * cin * in_itemsize + 2 * kout * out_itemsize + 4 * kout
    by_vmem = max(128, (vmem_budget // per_lane) // 128 * 128)
    max_tile = min(max_lanes, by_vmem)
    if dhw <= max_tile:
        return dhw, dhw                      # single full block, no pad
    for t in range(max_tile, 127, -128):     # largest 128-multiple divisor
        if dhw % t == 0:
            return t, dhw
    dhw_pad = pl.cdiv(dhw, max_tile) * max_tile
    return max_tile, dhw_pad                 # fallback: pad + slice after


def upsampling_deconv_block(x, weight, bias, *, stride=2, compute_dtype=None):
    """ConvTranspose3d(kernel=stride, stride=stride, padding=0) + ReLU.

    x:      (N, Cin, D, H, W)            NCDHW (PyTorch layout)
    weight: (Cin, Cout, s, s, s)         PyTorch ConvTranspose3d layout
    bias:   (Cout,)
    returns (N, Cout, D*s, H*s, W*s)
    """
    N, Cin, D, H, W = x.shape
    s = stride
    Cout = weight.shape[1]
    Kout = Cout * s * s * s
    DHW = D * H * W

    # Weight (Cin, Cout, s, s, s) -> (Kout, Cin); Kout ordered as (co, kd, kh, kw).
    w_t = weight.reshape(Cin, Kout).T
    # Bias broadcast across the s^3 sub-positions -> (Kout, 1), kept in f32.
    b_t = jnp.broadcast_to(bias[:, None], (Cout, s ** 3)).reshape(Kout, 1)
    b_t = b_t.astype(jnp.float32)

    # Contiguous view of NCDHW -> (N, Cin, DHW); no XLA transpose of the input.
    x2 = x.reshape(N, Cin, DHW)
    if compute_dtype is not None:            # e.g. jnp.bfloat16 on v6e/v7x
        x2 = x2.astype(compute_dtype)
        w_t = w_t.astype(compute_dtype)

    in_isz = jnp.dtype(x2.dtype).itemsize
    out_isz = jnp.dtype(x.dtype).itemsize
    t, dhw_pad = _pick_tile(DHW, Cin, Kout, in_isz, out_isz)
    if dhw_pad != DHW:
        x2 = jnp.pad(x2, ((0, 0), (0, 0), (0, dhw_pad - DHW)))

    grid = (N, dhw_pad // t)
    cost = pl.CostEstimate(
        flops=2 * N * dhw_pad * Cin * Kout,
        transcendentals=0,
        bytes_accessed=(N * Cin * dhw_pad * in_isz
                        + Kout * Cin * in_isz
                        + Kout * 4
                        + N * Kout * dhw_pad * out_isz),
    )

    out = pl.pallas_call(
        _deconv_mm_kernel,
        out_shape=jax.ShapeDtypeStruct((N, Kout, dhw_pad), x.dtype),
        grid_spec=pltpu.PrefetchScalarGridSpec(
            num_scalar_prefetch=0,
            grid=grid,
            in_specs=[
                pl.BlockSpec((1, Cin, t), lambda n, j: (n, 0, j)),
                pl.BlockSpec((Kout, Cin), lambda n, j: (0, 0)),
                pl.BlockSpec((Kout, 1), lambda n, j: (0, 0)),
            ],
            out_specs=pl.BlockSpec((1, Kout, t), lambda n, j: (n, 0, j)),
        ),
        compiler_params=pltpu.CompilerParams(
            dimension_semantics=("parallel", "parallel"),
            vmem_limit_bytes=32 * 1024 * 1024),
        cost_estimate=cost,
    )(x2, w_t, b_t)

    if dhw_pad != DHW:
        out = out[:, :, :DHW]                # drop relu(bias) garbage in the pad

    # Depth-to-space back to NCDHW: (N, Cout*s^3, D*H*W) -> (N, Cout, D*s, H*s, W*s)
    # TODO(synk): output depth-to-space kept in XLA; the (w, kw) lane interleave
    # has no dense-store in-kernel equivalent (would force strided/masked vst).
    out = out.reshape(N, Cout, s, s, s, D, H, W)
    out = jnp.transpose(out, (0, 1, 5, 2, 6, 3, 7, 4))   # (N, Cout, D, s, H, s, W, s)
    out = out.reshape(N, Cout, D * s, H * s, W * s)
    return out


if __name__ == "__main__":
    # Small shapes: batch=2, n_filters_in=4, n_filters_out=8, spatial=16, stride=2
    N, Cin, Cout, S, stride = 2, 4, 8, 16, 2

    key = jax.random.PRNGKey(0)
    kx, kw, kb = jax.random.split(key, 3)
    x = jax.random.normal(kx, (N, Cin, S, S, S), dtype=jnp.float32)
    # Deterministic parameter init (PyTorch ConvTranspose3d weight layout: (Cin, Cout, s, s, s))
    fan_in = Cin * stride ** 3
    bound = 1.0 / (fan_in ** 0.5)
    weight = jax.random.uniform(kw, (Cin, Cout, stride, stride, stride),
                                minval=-bound, maxval=bound, dtype=jnp.float32)
    bias = jax.random.uniform(kb, (Cout,), minval=-bound, maxval=bound,
                              dtype=jnp.float32)

    fn = jax.jit(functools.partial(upsampling_deconv_block, stride=stride))
    out = fn(x, weight, bias)
    out = jax.block_until_ready(out)

    # Reference: ConvTranspose3d == lhs-dilated conv with spatially-flipped,
    # IO-swapped kernel, padding (k-1) each side.  Then bias + ReLU.
    w_conv = jnp.flip(jnp.transpose(weight, (1, 0, 2, 3, 4)), axis=(2, 3, 4))  # OIDHW
    ref = jax.lax.conv_general_dilated(
        x, w_conv, window_strides=(1, 1, 1),
        padding=[(stride - 1, stride - 1)] * 3,
        lhs_dilation=(stride, stride, stride),
        dimension_numbers=("NCDHW", "OIDHW", "NCDHW"))
    ref = jnp.maximum(ref + bias.reshape(1, Cout, 1, 1, 1), 0.0)

    assert out.shape == (N, Cout, S * stride, S * stride, S * stride)
    assert jnp.allclose(out, ref, atol=1e-5, rtol=1e-5)
    print("KERNEL_OK")
</pallas_src>

<mosaic_0001>
module attributes {stable_mosaic.version = 11 : i64} {
  func.func @_deconv_mm_kernel(%arg0: i32, %arg1: i32, %arg2: memref<1x4x4096xf32, #tpu.memory_space<vmem>>, %arg3: memref<64x4xf32, #tpu.memory_space<vmem>>, %arg4: memref<64x1xf32, #tpu.memory_space<vmem>>, %arg5: memref<1x64x4096xf32, #tpu.memory_space<vmem>>) attributes {dimension_semantics = [#tpu.dimension_semantics<parallel>, #tpu.dimension_semantics<parallel>], iteration_bounds = array<i64: 2, 1>, scalar_prefetch = 0 : i64, scratch_operands = 0 : i64, tpu.core_type = #tpu.core_type<tc>, window_params = [{transform_indices = @transform_0, window_bounds = array<i64: 1, 4, 4096>}, {pipeline_mode = #tpu.pipeline_mode<synchronous>, transform_indices = @transform_1, window_bounds = array<i64: 64, 4>}, {pipeline_mode = #tpu.pipeline_mode<synchronous>, transform_indices = @transform_2, window_bounds = array<i64: 64, 1>}, {transform_indices = @transform_3, window_bounds = array<i64: 1, 64, 4096>}]} {
    %c0 = arith.constant 0 : index
    %c0_0 = arith.constant 0 : index
    %0 = vector.load %arg3[%c0, %c0_0] : memref<64x4xf32, #tpu.memory_space<vmem>>, vector<64x4xf32>
    %c0_1 = arith.constant 0 : index
    %c0_2 = arith.constant 0 : index
    %c0_3 = arith.constant 0 : index
    %1 = vector.load %arg2[%c0_1, %c0_2, %c0_3] : memref<1x4x4096xf32, #tpu.memory_space<vmem>>, vector<1x4x4096xf32>
    %2 = vector.shape_cast %1 : vector<1x4x4096xf32> to vector<4x4096xf32>
    %cst = arith.constant dense<0.000000e+00> : vector<64x4096xf32>
    %3 = tpu.matmul %0, %2, %cst {dimension_numbers = #tpu.dot_dimension_numbers<[1], [0], [0], [1], [0, 0, 1, 1], [], []>} : vector<64x4xf32>, vector<4x4096xf32>, vector<64x4096xf32> -> vector<64x4096xf32>
    %c0_4 = arith.constant 0 : index
    %c0_5 = arith.constant 0 : index
    %4 = vector.load %arg4[%c0_4, %c0_5] : memref<64x1xf32, #tpu.memory_space<vmem>>, vector<64x1xf32>
    %5 = vector.broadcast %4 : vector<64x1xf32> to vector<64x4096xf32>
    %6 = arith.addf %3, %5 : vector<64x4096xf32>
    %cst_6 = arith.constant 0.000000e+00 : f32
    %7 = vector.broadcast %cst_6 : f32 to vector<64x4096xf32>
    %8 = arith.maximumf %6, %7 : vector<64x4096xf32>
    %c0_7 = arith.constant 0 : index
    %c0_8 = arith.constant 0 : index
    %c0_9 = arith.constant 0 : index
    %9 = vector.load %arg5[%c0_7, %c0_8, %c0_9] : memref<1x64x4096xf32, #tpu.memory_space<vmem>>, vector<1x64x4096xf32>
    %10 = vector.shape_cast %9 : vector<1x64x4096xf32> to vector<64x4096xf32>
    %11 = vector.shape_cast %8 : vector<64x4096xf32> to vector<1x64x4096xf32>
    tpu.vector_store %arg5[%c0_7, %c0_8, %c0_9], %11 {strides = array<i32>} : memref<1x64x4096xf32, #tpu.memory_space<vmem>>, vector<1x64x4096xf32>,
    return
  }
  func.func @transform_0(%arg0: i32, %arg1: i32) -> (i32, i32, i32) {
    %c0_i32 = arith.constant 0 : i32
    %c0_i32_0 = arith.constant 0 : i32
    return %arg0, %c0_i32, %arg1 : i32, i32, i32
  }
  func.func @transform_1(%arg0: i32, %arg1: i32) -> (i32, i32) {
    %c0_i32 = arith.constant 0 : i32
    %c0_i32_0 = arith.constant 0 : i32
    %c0_i32_1 = arith.constant 0 : i32
    return %c0_i32, %c0_i32_0 : i32, i32
  }
  func.func @transform_2(%arg0: i32, %arg1: i32) -> (i32, i32) {
    %c0_i32 = arith.constant 0 : i32
    %c0_i32_0 = arith.constant 0 : i32
    %c0_i32_1 = arith.constant 0 : i32
    return %c0_i32, %c0_i32_0 : i32, i32
  }
  func.func @transform_3(%arg0: i32, %arg1: i32) -> (i32, i32, i32) {
    %c0_i32 = arith.constant 0 : i32
    %c0_i32_0 = arith.constant 0 : i32
    return %arg0, %c0_i32, %arg1 : i32, i32, i32
  }
}

</mosaic_0001>

<bundles_post_ra>
// kernel: upsampling_deconv_block.1
= control target key start
LH: loop header
LB: loop body
LE: loop exit
PB: predicated region body
PF: predicated region fallthrough
CT: control target
= control target key end

     0   :  { %s3074_s12 = smov 0   ;;  %s3076_s13 = smov 0   ;;  %s4149_s0 = inlined_call_operand.vmem [shape: f32[2,4,4096], index: 0, kind: input, shape index: {}]   ;;  %s4150_s1 = inlined_call_operand.vmem [shape: f32[64,4], index: 1, kind: input, shape index: {}]   ;;  %s4151_s2 = inlined_call_operand.vmem [shape: f32[64,1], index: 2, kind: input, shape index: {}]   ;;  %s4152_s3 = inlined_call_operand.vmem [shape: f32[2,64,4096], index: 3, kind: output, shape index: {}]  }
   0x1   :  { %s3078_s14 = smov 0  }
   0x2 LB: > { %s25_s15 = sadd.s32 1, %s3046_s13  ;;  %p2815_p0 = scmp.ge.s32.totalorder %s3050_s14, 1  ;;  %s3050_s14 = sphi %s3078_s14, %s13_s14   ;;  %s3046_s13 = sphi %s3076_s13, %s4154_s13   ;;  %s3042_s12 = sphi %s3074_s12, %s4153_s12  }
   0x3   : > { %p27_p1 = scmp.ge.s32.totalorder %s25_s15, 2  ;;  %p158_p2 = scmp.lt.s32.totalorder %s3050_s14, 3 }
   0x5   : > { %s4156_s15 = smov (%p27_p1, %s25_s15), 0  ;;  %p159_p3 = pnand %p2815_p0, %p158_p2 }
   0x6   : > { %p191_p4 = scmp.lt.s32.totalorder (!%p159_p3), %s3042_s12, 1  ;;  %v3052_v0 = vmov (!%p159_p3), 0.0   ;;  %v3053_v1 = vmov (!%p159_p3), 0   ;;  %v234_v2 = vld [vmem:[%s4151_s2] sm:$0xff] (!%p159_p3)  ;;  %v236_v3 = vld [vmem:[%s4151_s2 + $0x10] sm:$0xff] (!%p159_p3)  ;;  %v235_v4 = vld [vmem:[%s4151_s2 + $0x8] sm:$0xff] (!%p159_p3) }
   0x7   : > { %162 = sbr.rel (%p159_p3) target bundleno = 492 (0x1ec), region = 32  ;;  %468 = vmatprep.mubr.f32.mxu0 (!%p159_p3), %v3052_v0  ;;  %581 = vmatprep.mubr.f32.mxu1 (!%p159_p3), %v3052_v0  ;;  %v237_v5 = vld [vmem:[%s4151_s2 + $0x18] sm:$0xff] (!%p159_p3)  ;;  %vm339_vm0 = vcmask (!%p159_p3), 1043456   ;;  %v3121_v12 = vld [vmem:[%s4150_s1] sm:$0xff] (!%p159_p3)  ;;  %vm314_vm1 = vcmask (!%p159_p3), 31744   ;;  %v3142_v17 = vld [vmem:[%s4150_s1 + $0x8] sm:$0xff] (!%p159_p3) }
   0x8   : > { %3010 = vset.pattern.permute.xlu0 (!%p159_p3), %v3053_v1  ;;  %3011 = vset.pattern.permute.xlu1 (!%p159_p3), %v3053_v1  ;;  %v238_v20 = vld [vmem:[%s4151_s2 + $0x20] sm:$0xff] (!%p159_p3)  ;;  %v239_v21 = vld [vmem:[%s4151_s2 + $0x28] sm:$0xff] (!%p159_p3)  ;;  %v3167_v22 = vld [vmem:[%s4150_s1 + $0x10] sm:$0xff] (!%p159_p3) }
   0x9   : > { %244 = vperm.xlu0 (!%p159_p3), %3010, %v234_v2   ;;  %254 = vperm.xlu1 (!%p159_p3), %3011, %v236_v3   ;;  %v240_v23 = vld [vmem:[%s4151_s2 + $0x30] sm:$0xff] (!%p159_p3)  ;;  %v241_v24 = vld [vmem:[%s4151_s2 + $0x38] sm:$0xff] (!%p159_p3)  ;;  %v3197_v26 = vld [vmem:[%s4150_s1 + $0x20] sm:$0xff] (!%p159_p3) }
   0xa   : > { %v3186_v25 = vld [vmem:[%s4150_s1 + $0x18] sm:$0xff] (!%p159_p3)  ;;  %v3208_v27 = vld [vmem:[%s4150_s1 + $0x28] sm:$0xff] (!%p159_p3)  ;;  %v3219_v28 = vld [vmem:[%s4150_s1 + $0x30] sm:$0xff] (!%p159_p3) }
   0xb   : > { %v3230_v29 = vld [vmem:[%s4150_s1 + $0x38] sm:$0xff] (!%p159_p3) }
   0xd   : > { %249 = vperm.xlu0 (!%p159_p3), %3010, %v235_v4   ;;  %259 = vperm.xlu1 (!%p159_p3), %3011, %v237_v5  }
   0xe   : > { %s4158_s12 = smov (!%p191_p4, %s3042_s12), 1 }
   0xf   : > { %s2982_s20 = sshll.u32 %s4158_s12, 7 }
  0x10   : > { %s3106_s23 = scalar_lea.vmem %s4149_s0, %s2982_s20 }
  0x11   : > { %v218_v6 = vld [vmem:[%s3106_s23] sm:$0xff]  ;;  %v219_v7 = vld [vmem:[%s3106_s23 + $0x8] sm:$0xff]  ;;  %v220_v8 = vld [vmem:[%s3106_s23 + $0x10] sm:$0xff]  ;;  %264 = vperm.xlu0 %3010, %v238_v20   ;;  %269 = vperm.xlu1 %3011, %v239_v21  }
  0x12   : > { %v298_v9 = vcombine.high %v218_v6, %v218_v6  ;;  %v299_v10 = vcombine.high %v219_v7, %v219_v7  ;;  %v221_v11 = vld [vmem:[%s3106_s23 + $0x18] sm:$0xff]  ;;  %v300_v13 = vcombine.high %v220_v8, %v220_v8  ;;  %v3128_v15 = vld [vmem:[%s3106_s23 + $0x20] sm:$0xff]  ;;  %v3131_v16 = vld [vmem:[%s3106_s23 + $0x28] sm:$0xff] }
  0x13   : > { %v301_v14 = vcombine.high %v221_v11, %v221_v11  ;;  %v302_v18 = vcombine.high %v3128_v15, %v3128_v15  ;;  %v303_v19 = vcombine.high %v3131_v16, %v3131_v16  ;;  %v224_v30 = vld [vmem:[%s3106_s23 + $0x30] sm:$0xff]  ;;  %v225_v31 = vld [vmem:[%s3106_s23 + $0x38] sm:$0xff]  ;;  %v226_v34 = vld [vmem:[%s3106_s23 + $0x40] sm:$0xff] }
  0x14   : > { %2820 = vmatprep.subr.msk.mxu0 %vm339_vm0, %v298_v9  ;;  %2830 = vmatprep.subr.msk.mxu1 %vm339_vm0, %v299_v10  ;;  %v304_v32 = vcombine.high %v224_v30, %v224_v30  ;;  %v305_v33 = vcombine.high %v225_v31, %v225_v31  ;;  %v227_v35 = vld [vmem:[%s3106_s23 + $0x48] sm:$0xff]  ;;  %v306_v36 = vcombine.high %v226_v34, %v226_v34  ;;  %v228_v38 = vld [vmem:[%s3106_s23 + $0x50] sm:$0xff]  ;;  %v229_v39 = vld [vmem:[%s3106_s23 + $0x58] sm:$0xff] }
  0x15   : > { %2821 = vmatpush1.msk.msra.mxu0 %vm339_vm0, %v218_v6  ;;  %2831 = vmatpush1.msk.msra.mxu1 %vm339_vm0, %v219_v7  ;;  %v307_v37 = vcombine.high %v227_v35, %v227_v35  ;;  %v308_v40 = vcombine.high %v228_v38, %v228_v38  ;;  %v309_v41 = vcombine.high %v229_v39, %v229_v39  ;;  %v230_v42 = vld [vmem:[%s3106_s23 + $0x60] sm:$0xff]  ;;  %v231_v43 = vld [vmem:[%s3106_s23 + $0x68] sm:$0xff]  ;;  %v232_v46 = vld [vmem:[%s3106_s23 + $0x70] sm:$0xff] }
  0x16   : > { %2822 = vmatmul.mubr.msk.f32.vlgmr.msra.gmra.mrb[0].mxu0 %vm314_vm1, %v3121_v12  ;;  %2832 = vmatmul.mubr.msk.f32.vlgmr.msra.gmra.mrb[0].mxu1 %vm314_vm1, %v3121_v12  ;;  %v310_v44 = vcombine.high %v230_v42, %v230_v42  ;;  %v311_v45 = vcombine.high %v231_v43, %v231_v43  ;;  %v233_v47 = vld [vmem:[%s3106_s23 + $0x78] sm:$0xff]  ;;  %v312_v48 = vcombine.high %v232_v46, %v232_v46  ;;  %s2983_s23 = sshll.u32 %s4158_s12, 11 }
  0x17   : > { %2840 = vmatprep.subr.msk.mxu0 %vm339_vm0, %v300_v13  ;;  %2850 = vmatprep.subr.msk.mxu1 %vm339_vm0, %v301_v14  ;;  %v313_v49 = vcombine.high %v233_v47, %v233_v47  ;;  %s3554_s5 = scalar_lea.vmem %s4152_s3, %s2983_s23 }
  0x18   : > { %2841 = vmatpush1.msk.msra.mxu0 %vm339_vm0, %v220_v8  ;;  %2851 = vmatpush1.msk.msra.mxu1 %vm339_vm0, %v221_v11 }
  0x19   : > { %474 = vmatprep.mubr.f32.mxu0 %v3052_v0  ;;  %587 = vmatprep.mubr.f32.mxu1 %v3052_v0 }
  0x1a   : > { %2823 = vmatmul.mubr.msk.f32.gmra.mrb[2].mxu0 %vm314_vm1, %v3142_v17  ;;  %2833 = vmatmul.mubr.msk.f32.gmra.mrb[2].mxu1 %vm314_vm1, %v3142_v17 }
  0x1b   : > { %480 = vmatprep.mubr.f32.mxu0 %v3052_v0  ;;  %593 = vmatprep.mubr.f32.mxu1 %v3052_v0 }
  0x1c   : > { %2860 = vmatprep.subr.msk.mxu0 %vm339_vm0, %v302_v18  ;;  %2870 = vmatprep.subr.msk.mxu1 %vm339_vm0, %v303_v19 }
  0x1d   : > { %274 = vperm.xlu0 %3010, %v240_v23   ;;  %279 = vperm.xlu1 %3011, %v241_v24  }
  0x1e   : > { %2824 = vmatmul.mubr.msk.f32.gmra.mrb[4].mxu0 %vm314_vm1, %v3167_v22  ;;  %2834 = vmatmul.mubr.msk.f32.gmra.mrb[4].mxu1 %vm314_vm1, %v3167_v22 }
  0x1f   : > { %486 = vmatprep.mubr.f32.mxu0 %v3052_v0  ;;  %599 = vmatprep.mubr.f32.mxu1 %v3052_v0 }
  0x22   : > { %2825 = vmatmul.mubr.msk.f32.gmra.mrb[6].mxu0 %vm314_vm1, %v3186_v25  ;;  %2835 = vmatmul.mubr.msk.f32.gmra.mrb[6].mxu1 %vm314_vm1, %v3186_v25 }
  0x23   : > { %492 = vmatprep.mubr.f32.mxu0 %v3052_v0  ;;  %605 = vmatprep.mubr.f32.mxu1 %v3052_v0 }
  0x26   : > { %2826 = vmatmul.mubr.msk.f32.gmra.mrb[8].mxu0 %vm314_vm1, %v3197_v26  ;;  %2836 = vmatmul.mubr.msk.f32.gmra.mrb[8].mxu1 %vm314_vm1, %v3197_v26 }
  0x27   : > { %498 = vmatprep.mubr.f32.mxu0 %v3052_v0  ;;  %611 = vmatprep.mubr.f32.mxu1 %v3052_v0 }
  0x2a   : > { %2827 = vmatmul.mubr.msk.f32.gmra.mrb[10].mxu0 %vm314_vm1, %v3208_v27  ;;  %2837 = vmatmul.mubr.msk.f32.gmra.mrb[10].mxu1 %vm314_vm1, %v3208_v27 }
  0x2b   : > { %504 = vmatprep.mubr.f32.mxu0 %v3052_v0  ;;  %617 = vmatprep.mubr.f32.mxu1 %v3052_v0 }
  0x2e   : > { %2828 = vmatmul.mubr.msk.f32.gmra.mrb[12].mxu0 %vm314_vm1, %v3219_v28  ;;  %2838 = vmatmul.mubr.msk.f32.gmra.mrb[12].mxu1 %vm314_vm1, %v3219_v28 }
  0x2f   : > { %510 = vmatprep.mubr.f32.mxu0 %v3052_v0  ;;  %623 = vmatprep.mubr.f32.mxu1 %v3052_v0 }
  0x32   : > { %2829 = vmatmul.mubr.msk.f32.gmra.mrb[14].mxu0 %vm314_vm1, %v3230_v29  ;;  %2839 = vmatmul.mubr.msk.f32.gmra.mrb[14].mxu1 %vm314_vm1, %v3230_v29 }
  0x33   : > { %694 = vmatprep.mubr.f32.mxu0 %v3052_v0  ;;  %807 = vmatprep.mubr.f32.mxu1 %v3052_v0 }
  0x36   : > { %2842 = vmatmul.mubr.msk.f32.vlgmr.msra.gmra.mrb[16].mxu0 %vm314_vm1, %v3121_v12  ;;  %2852 = vmatmul.mubr.msk.f32.vlgmr.msra.gmra.mrb[16].mxu1 %vm314_vm1, %v3121_v12 }
  0x37   : > { %2861 = vmatpush1.msk.msra.mxu0 %vm339_vm0, %v3128_v15  ;;  %2871 = vmatpush1.msk.msra.mxu1 %vm339_vm0, %v3131_v16 }
  0x38   : > { %700 = vmatprep.mubr.f32.mxu0 %v3052_v0  ;;  %813 = vmatprep.mubr.f32.mxu1 %v3052_v0 }
  0x39   : > { %2880 = vmatprep.subr.msk.mxu0 %vm339_vm0, %v304_v32  ;;  %2890 = vmatprep.subr.msk.mxu1 %vm339_vm0, %v305_v33 }
  0x3a   : > { %2843 = vmatmul.mubr.msk.f32.gmra.mrb[18].mxu0 %vm314_vm1, %v3142_v17  ;;  %2853 = vmatmul.mubr.msk.f32.gmra.mrb[18].mxu1 %vm314_vm1, %v3142_v17 }
  0x3b   : > { %706 = vmatprep.mubr.f32.mxu0 %v3052_v0  ;;  %819 = vmatprep.mubr.f32.mxu1 %v3052_v0 }
  0x3e   : > { %2844 = vmatmul.mubr.msk.f32.gmra.mrb[20].mxu0 %vm314_vm1, %v3167_v22  ;;  %2854 = vmatmul.mubr.msk.f32.gmra.mrb[20].mxu1 %vm314_vm1, %v3167_v22 }
  0x3f   : > { %712 = vmatprep.mubr.f32.mxu0 %v3052_v0  ;;  %825 = vmatprep.mubr.f32.mxu1 %v3052_v0 }
  0x42   : > { %2845 = vmatmul.mubr.msk.f32.gmra.mrb[22].mxu0 %vm314_vm1, %v3186_v25  ;;  %2855 = vmatmul.mubr.msk.f32.gmra.mrb[22].mxu1 %vm314_vm1, %v3186_v25 }
  0x43   : > { %718 = vmatprep.mubr.f32.mxu0 %v3052_v0  ;;  %831 = vmatprep.mubr.f32.mxu1 %v3052_v0 }
  0x46   : > { %2846 = vmatmul.mubr.msk.f32.gmra.mrb[24].mxu0 %vm314_vm1, %v3197_v26  ;;  %2856 = vmatmul.mubr.msk.f32.gmra.mrb[24].mxu1 %vm314_vm1, %v3197_v26 }
  0x47   : > { %724 = vmatprep.mubr.f32.mxu0 %v3052_v0  ;;  %837 = vmatprep.mubr.f32.mxu1 %v3052_v0 }
  0x4a   : > { %2847 = vmatmul.mubr.msk.f32.gmra.mrb[26].mxu0 %vm314_vm1, %v3208_v27  ;;  %2857 = vmatmul.mubr.msk.f32.gmra.mrb[26].mxu1 %vm314_vm1, %v3208_v27 }
  0x4b   : > { %730 = vmatprep.mubr.f32.mxu0 %v3052_v0  ;;  %843 = vmatprep.mubr.f32.mxu1 %v3052_v0 }
  0x4e   : > { %2848 = vmatmul.mubr.msk.f32.gmra.mrb[28].mxu0 %vm314_vm1, %v3219_v28  ;;  %2858 = vmatmul.mubr.msk.f32.gmra.mrb[28].mxu1 %vm314_vm1, %v3219_v28 }
  0x4f   : > { %736 = vmatprep.mubr.f32.mxu0 %v3052_v0  ;;  %849 = vmatprep.mubr.f32.mxu1 %v3052_v0 }
  0x52   : > { %2849 = vmatmul.mubr.msk.f32.gmra.mrb[30].mxu0 %vm314_vm1, %v3230_v29  ;;  %2859 = vmatmul.mubr.msk.f32.gmra.mrb[30].mxu1 %vm314_vm1, %v3230_v29 }
  0x53   : > { %920 = vmatprep.mubr.f32.mxu0 %v3052_v0  ;;  %1033 = vmatprep.mubr.f32.mxu1 %v3052_v0 }
  0x56   : > { %2862 = vmatmul.mubr.msk.f32.vlgmr.msra.gmra.mrb[32].mxu0 %vm314_vm1, %v3121_v12  ;;  %2872 = vmatmul.mubr.msk.f32.vlgmr.msra.gmra.mrb[32].mxu1 %vm314_vm1, %v3121_v12 }
  0x57   : > { %2881 = vmatpush1.msk.msra.mxu0 %vm339_vm0, %v224_v30  ;;  %2891 = vmatpush1.msk.msra.mxu1 %vm339_vm0, %v225_v31 }
  0x58   : > { %926 = vmatprep.mubr.f32.mxu0 %v3052_v0  ;;  %1039 = vmatprep.mubr.f32.mxu1 %v3052_v0 }
  0x59   : > { %2900 = vmatprep.subr.msk.mxu0 %vm339_vm0, %v306_v36  ;;  %2910 = vmatprep.subr.msk.mxu1 %vm339_vm0, %v307_v37 }
  0x5a   : > { %2863 = vmatmul.mubr.msk.f32.gmra.mrb[34].mxu0 %vm314_vm1, %v3142_v17  ;;  %2873 = vmatmul.mubr.msk.f32.gmra.mrb[34].mxu1 %vm314_vm1, %v3142_v17 }
  0x5b   : > { %932 = vmatprep.mubr.f32.mxu0 %v3052_v0  ;;  %1045 = vmatprep.mubr.f32.mxu1 %v3052_v0 }
  0x5e   : > { %2864 = vmatmul.mubr.msk.f32.gmra.mrb[36].mxu0 %vm314_vm1, %v3167_v22  ;;  %2874 = vmatmul.mubr.msk.f32.gmra.mrb[36].mxu1 %vm314_vm1, %v3167_v22 }
  0x5f   : > { %938 = vmatprep.mubr.f32.mxu0 %v3052_v0  ;;  %1051 = vmatprep.mubr.f32.mxu1 %v3052_v0 }
  0x62   : > { %2865 = vmatmul.mubr.msk.f32.gmra.mrb[38].mxu0 %vm314_vm1, %v3186_v25  ;;  %2875 = vmatmul.mubr.msk.f32.gmra.mrb[38].mxu1 %vm314_vm1, %v3186_v25 }
  0x63   : > { %944 = vmatprep.mubr.f32.mxu0 %v3052_v0  ;;  %1057 = vmatprep.mubr.f32.mxu1 %v3052_v0 }
  0x66   : > { %2866 = vmatmul.mubr.msk.f32.gmra.mrb[40].mxu0 %vm314_vm1, %v3197_v26  ;;  %2876 = vmatmul.mubr.msk.f32.gmra.mrb[40].mxu1 %vm314_vm1, %v3197_v26 }
  0x67   : > { %950 = vmatprep.mubr.f32.mxu0 %v3052_v0  ;;  %1063 = vmatprep.mubr.f32.mxu1 %v3052_v0 }
  0x6a   : > { %2867 = vmatmul.mubr.msk.f32.gmra.mrb[42].mxu0 %vm314_vm1, %v3208_v27  ;;  %2877 = vmatmul.mubr.msk.f32.gmra.mrb[42].mxu1 %vm314_vm1, %v3208_v27 }
  0x6b   : > { %956 = vmatprep.mubr.f32.mxu0 %v3052_v0  ;;  %1069 = vmatprep.mubr.f32.mxu1 %v3052_v0 }
  0x6e   : > { %2868 = vmatmul.mubr.msk.f32.gmra.mrb[44].mxu0 %vm314_vm1, %v3219_v28  ;;  %2878 = vmatmul.mubr.msk.f32.gmra.mrb[44].mxu1 %vm314_vm1, %v3219_v28 }
  0x6f   : > { %962 = vmatprep.mubr.f32.mxu0 %v3052_v0  ;;  %1075 = vmatprep.mubr.f32.mxu1 %v3052_v0 }
  0x72   : > { %2869 = vmatmul.mubr.msk.f32.gmra.mrb[46].mxu0 %vm314_vm1, %v3230_v29  ;;  %2879 = vmatmul.mubr.msk.f32.gmra.mrb[46].mxu1 %vm314_vm1, %v3230_v29 }
  0x73   : > { %1146 = vmatprep.mubr.f32.mxu0 %v3052_v0  ;;  %1259 = vmatprep.mubr.f32.mxu1 %v3052_v0 }
  0x76   : > { %2882 = vmatmul.mubr.msk.f32.vlgmr.msra.gmra.mrb[48].mxu0 %vm314_vm1, %v3121_v12  ;;  %2892 = vmatmul.mubr.msk.f32.vlgmr.msra.gmra.mrb[48].mxu1 %vm314_vm1, %v3121_v12 }
  0x77   : > { %2901 = vmatpush1.msk.msra.mxu0 %vm339_vm0, %v226_v34  ;;  %2911 = vmatpush1.msk.msra.mxu1 %vm339_vm0, %v227_v35 }
  0x78   : > { %1152 = vmatprep.mubr.f32.mxu0 %v3052_v0  ;;  %1265 = vmatprep.mubr.f32.mxu1 %v3052_v0 }
  0x79   : > { %2920 = vmatprep.subr.msk.mxu0 %vm339_vm0, %v308_v40  ;;  %2930 = vmatprep.subr.msk.mxu1 %vm339_vm0, %v309_v41 }
  0x7a   : > { %2883 = vmatmul.mubr.msk.f32.gmra.mrb[50].mxu0 %vm314_vm1, %v3142_v17  ;;  %2893 = vmatmul.mubr.msk.f32.gmra.mrb[50].mxu1 %vm314_vm1, %v3142_v17 }
  0x7b   : > { %1158 = vmatprep.mubr.f32.mxu0 %v3052_v0  ;;  %1271 = vmatprep.mubr.f32.mxu1 %v3052_v0 }
  0x7e   : > { %2884 = vmatmul.mubr.msk.f32.gmra.mrb[52].mxu0 %vm314_vm1, %v3167_v22  ;;  %2894 = vmatmul.mubr.msk.f32.gmra.mrb[52].mxu1 %vm314_vm1, %v3167_v22 }
  0x7f   : > { %1164 = vmatprep.mubr.f32.mxu0 %v3052_v0  ;;  %1277 = vmatprep.mubr.f32.mxu1 %v3052_v0 }
  0x82   : > { %2885 = vmatmul.mubr.msk.f32.gmra.mrb[54].mxu0 %vm314_vm1, %v3186_v25  ;;  %2895 = vmatmul.mubr.msk.f32.gmra.mrb[54].mxu1 %vm314_vm1, %v3186_v25 }
  0x83   : > { %1170 = vmatprep.mubr.f32.mxu0 %v3052_v0  ;;  %1283 = vmatprep.mubr.f32.mxu1 %v3052_v0 }
  0x86   : > { %2886 = vmatmul.mubr.msk.f32.gmra.mrb[56].mxu0 %vm314_vm1, %v3197_v26  ;;  %2896 = vmatmul.mubr.msk.f32.gmra.mrb[56].mxu1 %vm314_vm1, %v3197_v26 }
  0x87   : > { %1176 = vmatprep.mubr.f32.mxu0 %v3052_v0  ;;  %1289 = vmatprep.mubr.f32.mxu1 %v3052_v0 }
  0x88   : > { %v3536_v50 = vpop.permute.xlu0 %244  ;;  %v3562_v62 = vpop.permute.xlu1 %254 }
  0x8a   : > { %2887 = vmatmul.mubr.msk.f32.gmra.mrb[58].mxu0 %vm314_vm1, %v3208_v27  ;;  %2897 = vmatmul.mubr.msk.f32.gmra.mrb[58].mxu1 %vm314_vm1, %v3208_v27 }
  0x8b   : > { %1182 = vmatprep.mubr.f32.mxu0 %v3052_v0  ;;  %1295 = vmatprep.mubr.f32.mxu1 %v3052_v0 }
  0x8c   : > { %v3560_v59 = vpop.permute.xlu0 %249  ;;  %v3592_v30 = vpop.permute.xlu1 %259 }
  0x8e   : > { %2888 = vmatmul.mubr.msk.f32.gmra.mrb[60].mxu0 %vm314_vm1, %v3219_v28  ;;  %2898 = vmatmul.mubr.msk.f32.gmra.mrb[60].mxu1 %vm314_vm1, %v3219_v28 }
  0x8f   : > { %1188 = vmatprep.mubr.f32.mxu0 %v3052_v0  ;;  %1301 = vmatprep.mubr.f32.mxu1 %v3052_v0 }
  0x92   : > { %2889 = vmatmul.mubr.msk.f32.gmra.mrb[62].mxu0 %vm314_vm1, %v3230_v29  ;;  %2899 = vmatmul.mubr.msk.f32.gmra.mrb[62].mxu1 %vm314_vm1, %v3230_v29 }
  0x93   : > { %1372 = vmatprep.mubr.f32.mxu0 %v3052_v0  ;;  %1485 = vmatprep.mubr.f32.mxu1 %v3052_v0 }
  0x96   : > { %2902 = vmatmul.mubr.msk.f32.vlgmr.msra.gmra.mrb[64].mxu0 %vm314_vm1, %v3121_v12  ;;  %2912 = vmatmul.mubr.msk.f32.vlgmr.msra.gmra.mrb[64].mxu1 %vm314_vm1, %v3121_v12 }
  0x97   : > { %2921 = vmatpush1.msk.msra.mxu0 %vm339_vm0, %v228_v38  ;;  %2931 = vmatpush1.msk.msra.mxu1 %vm339_vm0, %v229_v39 }
  0x98   : > { %1378 = vmatprep.mubr.f32.mxu0 %v3052_v0  ;;  %1491 = vmatprep.mubr.f32.mxu1 %v3052_v0 }
  0x99   : > { %2940 = vmatprep.subr.msk.mxu0 %vm339_vm0, %v310_v44  ;;  %2950 = vmatprep.subr.msk.mxu1 %vm339_vm0, %v311_v45 }
  0x9a   : > { %2903 = vmatmul.mubr.msk.f32.gmra.mrb[66].mxu0 %vm314_vm1, %v3142_v17  ;;  %2913 = vmatmul.mubr.msk.f32.gmra.mrb[66].mxu1 %vm314_vm1, %v3142_v17 }
  0x9b   : > { %1384 = vmatprep.mubr.f32.mxu0 %v3052_v0  ;;  %1497 = vmatprep.mubr.f32.mxu1 %v3052_v0 }
  0x9e   : > { %2904 = vmatmul.mubr.msk.f32.gmra.mrb[68].mxu0 %vm314_vm1, %v3167_v22  ;;  %2914 = vmatmul.mubr.msk.f32.gmra.mrb[68].mxu1 %vm314_vm1, %v3167_v22 }
  0x9f   : > { %1390 = vmatprep.mubr.f32.mxu0 %v3052_v0  ;;  %1503 = vmatprep.mubr.f32.mxu1 %v3052_v0 }
  0xa2   : > { %2905 = vmatmul.mubr.msk.f32.gmra.mrb[70].mxu0 %vm314_vm1, %v3186_v25  ;;  %2915 = vmatmul.mubr.msk.f32.gmra.mrb[70].mxu1 %vm314_vm1, %v3186_v25 }
  0xa3   : > { %1396 = vmatprep.mubr.f32.mxu0 %v3052_v0  ;;  %1509 = vmatprep.mubr.f32.mxu1 %v3052_v0 }
  0xa6   : > { %2906 = vmatmul.mubr.msk.f32.gmra.mrb[72].mxu0 %vm314_vm1, %v3197_v26  ;;  %2916 = vmatmul.mubr.msk.f32.gmra.mrb[72].mxu1 %vm314_vm1, %v3197_v26 }
  0xa7   : > { %1402 = vmatprep.mubr.f32.mxu0 %v3052_v0  ;;  %1515 = vmatprep.mubr.f32.mxu1 %v3052_v0 }
  0xaa   : > { %2907 = vmatmul.mubr.msk.f32.gmra.mrb[74].mxu0 %vm314_vm1, %v3208_v27  ;;  %2917 = vmatmul.mubr.msk.f32.gmra.mrb[74].mxu1 %vm314_vm1, %v3208_v27 }
  0xab   : > { %1408 = vmatprep.mubr.f32.mxu0 %v3052_v0  ;;  %1521 = vmatprep.mubr.f32.mxu1 %v3052_v0 }
  0xae   : > { %2908 = vmatmul.mubr.msk.f32.gmra.mrb[76].mxu0 %vm314_vm1, %v3219_v28  ;;  %2918 = vmatmul.mubr.msk.f32.gmra.mrb[76].mxu1 %vm314_vm1, %v3219_v28 }
  0xaf   : > { %1414 = vmatprep.mubr.f32.mxu0 %v3052_v0  ;;  %1527 = vmatprep.mubr.f32.mxu1 %v3052_v0 }
  0xb2   : > { %2909 = vmatmul.mubr.msk.f32.gmra.mrb[78].mxu0 %vm314_vm1, %v3230_v29  ;;  %2919 = vmatmul.mubr.msk.f32.gmra.mrb[78].mxu1 %vm314_vm1, %v3230_v29 }
  0xb3   : > { %1598 = vmatprep.mubr.f32.mxu0 %v3052_v0  ;;  %1711 = vmatprep.mubr.f32.mxu1 %v3052_v0 }
  0xb6   : > { %2922 = vmatmul.mubr.msk.f32.vlgmr.msra.gmra.mrb[80].mxu0 %vm314_vm1, %v3121_v12  ;;  %2932 = vmatmul.mubr.msk.f32.vlgmr.msra.gmra.mrb[80].mxu1 %vm314_vm1, %v3121_v12 }
  0xb7   : > { %2941 = vmatpush1.msk.msra.mxu0 %vm339_vm0, %v230_v42  ;;  %2951 = vmatpush1.msk.msra.mxu1 %vm339_vm0, %v231_v43  ;;  %v3608_v43 = vpop.permute.xlu0 %264 }
  0xb8   : > { %1604 = vmatprep.mubr.f32.mxu0 %v3052_v0  ;;  %1717 = vmatprep.mubr.f32.mxu1 %v3052_v0 }
  0xb9   : > { %2960 = vmatprep.subr.msk.mxu0 %vm339_vm0, %v312_v48  ;;  %2970 = vmatprep.subr.msk.mxu1 %vm339_vm0, %v313_v49 }
  0xba   : > { %2923 = vmatmul.mubr.msk.f32.gmra.mrb[82].mxu0 %vm314_vm1, %v3142_v17  ;;  %2933 = vmatmul.mubr.msk.f32.gmra.mrb[82].mxu1 %vm314_vm1, %v3142_v17 }
  0xbb   : > { %1610 = vmatprep.mubr.f32.mxu0 %v3052_v0  ;;  %1723 = vmatprep.mubr.f32.mxu1 %v3052_v0 }
  0xbe   : > { %2924 = vmatmul.mubr.msk.f32.gmra.mrb[84].mxu0 %vm314_vm1, %v3167_v22  ;;  %2934 = vmatmul.mubr.msk.f32.gmra.mrb[84].mxu1 %vm314_vm1, %v3167_v22 }
  0xbf   : > { %1616 = vmatprep.mubr.f32.mxu0 %v3052_v0  ;;  %1729 = vmatprep.mubr.f32.mxu1 %v3052_v0 }
  0xc2   : > { %2925 = vmatmul.mubr.msk.f32.gmra.mrb[86].mxu0 %vm314_vm1, %v3186_v25  ;;  %2935 = vmatmul.mubr.msk.f32.gmra.mrb[86].mxu1 %vm314_vm1, %v3186_v25 }
  0xc3   : > { %1622 = vmatprep.mubr.f32.mxu0 %v3052_v0  ;;  %1735 = vmatprep.mubr.f32.mxu1 %v3052_v0 }
  0xc6   : > { %2926 = vmatmul.mubr.msk.f32.gmra.mrb[88].mxu0 %vm314_vm1, %v3197_v26  ;;  %2936 = vmatmul.mubr.msk.f32.gmra.mrb[88].mxu1 %vm314_vm1, %v3197_v26 }
  0xc7   : > { %1628 = vmatprep.mubr.f32.mxu0 %v3052_v0  ;;  %1741 = vmatprep.mubr.f32.mxu1 %v3052_v0 }
  0xca   : > { %2927 = vmatmul.mubr.msk.f32.gmra.mrb[90].mxu0 %vm314_vm1, %v3208_v27  ;;  %2937 = vmatmul.mubr.msk.f32.gmra.mrb[90].mxu1 %vm314_vm1, %v3208_v27 }
  0xcb   : > { %1634 = vmatprep.mubr.f32.mxu0 %v3052_v0  ;;  %1747 = vmatprep.mubr.f32.mxu1 %v3052_v0 }
  0xce   : > { %2928 = vmatmul.mubr.msk.f32.gmra.mrb[92].mxu0 %vm314_vm1, %v3219_v28  ;;  %2938 = vmatmul.mubr.msk.f32.gmra.mrb[92].mxu1 %vm314_vm1, %v3219_v28 }
  0xcf   : > { %1640 = vmatprep.mubr.f32.mxu0 %v3052_v0  ;;  %1753 = vmatprep.mubr.f32.mxu1 %v3052_v0 }
  0xd2   : > { %2929 = vmatmul.mubr.msk.f32.gmra.mrb[94].mxu0 %vm314_vm1, %v3230_v29  ;;  %2939 = vmatmul.mubr.msk.f32.gmra.mrb[94].mxu1 %vm314_vm1, %v3230_v29 }
  0xd3   : > { %1824 = vmatprep.mubr.f32.mxu0 %v3052_v0  ;;  %1937 = vmatprep.mubr.f32.mxu1 %v3052_v0 }
  0xd6   : > { %2942 = vmatmul.mubr.msk.f32.vlgmr.msra.gmra.mrb[96].mxu0 %vm314_vm1, %v3121_v12  ;;  %2952 = vmatmul.mubr.msk.f32.vlgmr.msra.gmra.mrb[96].mxu1 %vm314_vm1, %v3121_v12 }
  0xd7   : > { %2961 = vmatpush1.msk.msra.mxu0 %vm339_vm0, %v232_v46  ;;  %2971 = vmatpush1.msk.msra.mxu1 %vm339_vm0, %v233_v47 }
  0xd8   : > { %1830 = vmatprep.mubr.f32.mxu0 %v3052_v0  ;;  %1943 = vmatprep.mubr.f32.mxu1 %v3052_v0 }
  0xda   : > { %2943 = vmatmul.mubr.msk.f32.gmra.mrb[98].mxu0 %vm314_vm1, %v3142_v17  ;;  %2953 = vmatmul.mubr.msk.f32.gmra.mrb[98].mxu1 %vm314_vm1, %v3142_v17 }
  0xdb   : > { %1836 = vmatprep.mubr.f32.mxu0 %v3052_v0  ;;  %1949 = vmatprep.mubr.f32.mxu1 %v3052_v0 }
  0xde   : > { %2944 = vmatmul.mubr.msk.f32.gmra.mrb[100].mxu0 %vm314_vm1, %v3167_v22  ;;  %2954 = vmatmul.mubr.msk.f32.gmra.mrb[100].mxu1 %vm314_vm1, %v3167_v22 }
  0xdf   : > { %1842 = vmatprep.mubr.f32.mxu0 %v3052_v0  ;;  %1955 = vmatprep.mubr.f32.mxu1 %v3052_v0 }
  0xe2   : > { %2945 = vmatmul.mubr.msk.f32.gmra.mrb[102].mxu0 %vm314_vm1, %v3186_v25  ;;  %2955 = vmatmul.mubr.msk.f32.gmra.mrb[102].mxu1 %vm314_vm1, %v3186_v25 }
  0xe3   : > { %1848 = vmatprep.mubr.f32.mxu0 %v3052_v0  ;;  %1961 = vmatprep.mubr.f32.mxu1 %v3052_v0 }
  0xe6   : > { %2946 = vmatmul.mubr.msk.f32.gmra.mrb[104].mxu0 %vm314_vm1, %v3197_v26  ;;  %2956 = vmatmul.mubr.msk.f32.gmra.mrb[104].mxu1 %vm314_vm1, %v3197_v26 }
  0xe7   : > { %1854 = vmatprep.mubr.f32.mxu0 %v3052_v0  ;;  %1967 = vmatprep.mubr.f32.mxu1 %v3052_v0 }
  0xe9   : > { %v470_v51 = vpop.f32.mrb[0].mxu0  ;;  %v583_v52 = vpop.f32.mrb[0].mxu1 }
  0xea   : > { %v471_v53 = vadd.f32 %v470_v51, %v3536_v50  ;;  %v584_v54 = vadd.f32 %v583_v52, %v3536_v50  ;;  %v472_v55 = vpop.f32.mrb[1].mxu0  ;;  %v585_v56 = vpop.f32.mrb[1].mxu1  ;;  %2947 = vmatmul.mubr.msk.f32.gmra.mrb[106].mxu0 %vm314_vm1, %v3208_v27  ;;  %2957 = vmatmul.mubr.msk.f32.gmra.mrb[106].mxu1 %vm314_vm1, %v3208_v27 }
  0xeb   : > { %v473_v57 = vadd.f32 %v472_v55, %v3536_v50  ;;  %v586_v58 = vadd.f32 %v585_v56, %v3536_v50  ;;  %1860 = vmatprep.mubr.f32.mxu0 %v3052_v0  ;;  %1973 = vmatprep.mubr.f32.mxu1 %v3052_v0  ;;  %v3624_v56 = vpop.permute.xlu1 %269 }
  0xec   : > { %v2212_v60 = vmax.f32 %v471_v53, 0.0  ;;  %v2214_v61 = vmax.f32 %v584_v54, 0.0 }
  0xed   : > { %v2213_v63 = vmax.f32 %v473_v57, 0.0  ;;  %v2215_v1 = vmax.f32 %v586_v58, 0.0  ;;  %v476_v2 = vpop.f32.mrb[2].mxu0  ;;  %v589_v3 = vpop.f32.mrb[2].mxu1 }
  0xee   : > { %2468 = vst [vmem:[%s3554_s5] sm:$0xff] %v2212_v60  ;;  %2470 = vst [vmem:[%s3554_s5 + $0x10] sm:$0xff] %v2214_v61  ;;  %v477_v4 = vadd.f32 %v476_v2, %v3560_v59  ;;  %v590_v5 = vadd.f32 %v589_v3, %v3560_v59  ;;  %v478_v6 = vpop.f32.mrb[3].mxu0  ;;  %v591_v7 = vpop.f32.mrb[3].mxu1  ;;  %2948 = vmatmul.mubr.msk.f32.gmra.mrb[108].mxu0 %vm314_vm1, %v3219_v28  ;;  %2958 = vmatmul.mubr.msk.f32.gmra.mrb[108].mxu1 %vm314_vm1, %v3219_v28 }
  0xef   : > { %2469 = vst [vmem:[%s3554_s5 + $0x8] sm:$0xff] %v2213_v63  ;;  %2471 = vst [vmem:[%s3554_s5 + $0x18] sm:$0xff] %v2215_v1  ;;  %v479_v8 = vadd.f32 %v478_v6, %v3560_v59  ;;  %v592_v9 = vadd.f32 %v591_v7, %v3560_v59  ;;  %1866 = vmatprep.mubr.f32.mxu0 %v3052_v0  ;;  %1979 = vmatprep.mubr.f32.mxu1 %v3052_v0  ;;  %v3640_v7 = vpop.permute.xlu0 %274 }
  0xf0   : > { %v2244_v10 = vmax.f32 %v477_v4, 0.0  ;;  %v2246_v11 = vmax.f32 %v590_v5, 0.0 }
  0xf1   : > { %v2245_v13 = vmax.f32 %v479_v8, 0.0  ;;  %v2247_v14 = vmax.f32 %v592_v9, 0.0  ;;  %v482_v15 = vpop.f32.mrb[4].mxu0  ;;  %v595_v16 = vpop.f32.mrb[4].mxu1 }
  0xf2   : > { %2500 = vst [vmem:[%s3554_s5 + $0x100] sm:$0xff] %v2244_v10  ;;  %2502 = vst [vmem:[%s3554_s5 + $0x110] sm:$0xff] %v2246_v11  ;;  %v483_v18 = vadd.f32 %v482_v15, %v3562_v62  ;;  %v596_v19 = vadd.f32 %v595_v16, %v3562_v62  ;;  %v484_v20 = vpop.f32.mrb[5].mxu0  ;;  %v597_v21 = vpop.f32.mrb[5].mxu1  ;;  %2949 = vmatmul.mubr.msk.f32.gmra.mrb[110].mxu0 %vm314_vm1, %v3230_v29  ;;  %2959 = vmatmul.mubr.msk.f32.gmra.mrb[110].mxu1 %vm314_vm1, %v3230_v29 }
  0xf3   : > { %2501 = vst [vmem:[%s3554_s5 + $0x108] sm:$0xff] %v2245_v13  ;;  %2503 = vst [vmem:[%s3554_s5 + $0x118] sm:$0xff] %v2247_v14  ;;  %v485_v23 = vadd.f32 %v484_v20, %v3562_v62  ;;  %v598_v24 = vadd.f32 %v597_v21, %v3562_v62  ;;  %2050 = vmatprep.mubr.f32.mxu0 %v3052_v0  ;;  %2163 = vmatprep.mubr.f32.mxu1 %v3052_v0  ;;  %v3656_v21 = vpop.permute.xlu1 %279 }
  0xf4   : > { %v2276_v31 = vmax.f32 %v483_v18, 0.0  ;;  %v2278_v32 = vmax.f32 %v596_v19, 0.0 }
  0xf5   : > { %v2277_v33 = vmax.f32 %v485_v23, 0.0  ;;  %v2279_v34 = vmax.f32 %v598_v24, 0.0  ;;  %v488_v35 = vpop.f32.mrb[6].mxu0  ;;  %v601_v36 = vpop.f32.mrb[6].mxu1 }
  0xf6   : > { %2532 = vst [vmem:[%s3554_s5 + $0x200] sm:$0xff] %v2276_v31  ;;  %2534 = vst [vmem:[%s3554_s5 + $0x210] sm:$0xff] %v2278_v32  ;;  %v489_v37 = vadd.f32 %v488_v35, %v3592_v30  ;;  %v602_v38 = vadd.f32 %v601_v36, %v3592_v30  ;;  %v490_v39 = vpop.f32.mrb[7].mxu0  ;;  %v603_v40 = vpop.f32.mrb[7].mxu1  ;;  %2962 = vmatmul.mubr.msk.f32.vlgmr.msra.gmra.mrb[112].mxu0 %vm314_vm1, %v3121_v12  ;;  %2972 = vmatmul.mubr.msk.f32.vlgmr.msra.gmra.mrb[112].mxu1 %vm314_vm1, %v3121_v12 }
  0xf7   : > { %2533 = vst [vmem:[%s3554_s5 + $0x208] sm:$0xff] %v2277_v33  ;;  %2535 = vst [vmem:[%s3554_s5 + $0x218] sm:$0xff] %v2279_v34  ;;  %v491_v41 = vadd.f32 %v490_v39, %v3592_v30  ;;  %v604_v42 = vadd.f32 %v603_v40, %v3592_v30  ;;  %2056 = vmatprep.mubr.f32.mxu0 %v3052_v0  ;;  %2169 = vmatprep.mubr.f32.mxu1 %v3052_v0 }
  0xf8   : > { %v2308_v44 = vmax.f32 %v489_v37, 0.0  ;;  %v2310_v45 = vmax.f32 %v602_v38, 0.0 }
  0xf9   : > { %v2309_v46 = vmax.f32 %v491_v41, 0.0  ;;  %v2311_v47 = vmax.f32 %v604_v42, 0.0  ;;  %v494_v48 = vpop.f32.mrb[8].mxu0  ;;  %v607_v12 = vpop.f32.mrb[8].mxu1 }
  0xfa   : > { %2564 = vst [vmem:[%s3554_s5 + $0x300] sm:$0xff] %v2308_v44  ;;  %2566 = vst [vmem:[%s3554_s5 + $0x310] sm:$0xff] %v2310_v45  ;;  %v495_v49 = vadd.f32 %v494_v48, %v3608_v43  ;;  %v608_v51 = vadd.f32 %v607_v12, %v3608_v43  ;;  %v496_v52 = vpop.f32.mrb[9].mxu0  ;;  %v609_v53 = vpop.f32.mrb[9].mxu1  ;;  %2963 = vmatmul.mubr.msk.f32.gmra.mrb[114].mxu0 %vm314_vm1, %v3142_v17  ;;  %2973 = vmatmul.mubr.msk.f32.gmra.mrb[114].mxu1 %vm314_vm1, %v3142_v17 }
  0xfb   : > { %2565 = vst [vmem:[%s3554_s5 + $0x308] sm:$0xff] %v2309_v46  ;;  %2567 = vst [vmem:[%s3554_s5 + $0x318] sm:$0xff] %v2311_v47  ;;  %v497_v54 = vadd.f32 %v496_v52, %v3608_v43  ;;  %v610_v55 = vadd.f32 %v609_v53, %v3608_v43  ;;  %2062 = vmatprep.mubr.f32.mxu0 %v3052_v0  ;;  %2175 = vmatprep.mubr.f32.mxu1 %v3052_v0 }
  0xfc   : > { %v2340_v57 = vmax.f32 %v495_v49, 0.0  ;;  %v2342_v58 = vmax.f32 %v608_v51, 0.0 }
  0xfd   : > { %v2341_v60 = vmax.f32 %v497_v54, 0.0  ;;  %v2343_v61 = vmax.f32 %v610_v55, 0.0  ;;  %v500_v63 = vpop.f32.mrb[10].mxu0  ;;  %v613_v17 = vpop.f32.mrb[10].mxu1 }
  0xfe   : > { %2596 = vst [vmem:[%s3554_s5 + $0x400] sm:$0xff] %v2340_v57  ;;  %2598 = vst [vmem:[%s3554_s5 + $0x410] sm:$0xff] %v2342_v58  ;;  %v501_v1 = vadd.f32 %v500_v63, %v3624_v56  ;;  %v614_v2 = vadd.f32 %v613_v17, %v3624_v56  ;;  %v502_v3 = vpop.f32.mrb[11].mxu0  ;;  %v615_v4 = vpop.f32.mrb[11].mxu1  ;;  %2964 = vmatmul.mubr.msk.f32.gmra.mrb[116].mxu0 %vm314_vm1, %v3167_v22  ;;  %2974 = vmatmul.mubr.msk.f32.gmra.mrb[116].mxu1 %vm314_vm1, %v3167_v22 }
  0xff   : > { %2597 = vst [vmem:[%s3554_s5 + $0x408] sm:$0xff] %v2341_v60  ;;  %2599 = vst [vmem:[%s3554_s5 + $0x418] sm:$0xff] %v2343_v61  ;;  %v503_v5 = vadd.f32 %v502_v3, %v3624_v56  ;;  %v616_v6 = vadd.f32 %v615_v4, %v3624_v56  ;;  %2068 = vmatprep.mubr.f32.mxu0 %v3052_v0  ;;  %2181 = vmatprep.mubr.f32.mxu1 %v3052_v0 }
 0x100   : > { %v2372_v8 = vmax.f32 %v501_v1, 0.0  ;;  %v2374_v9 = vmax.f32 %v614_v2, 0.0 }
 0x101   : > { %v2373_v10 = vmax.f32 %v503_v5, 0.0  ;;  %v2375_v11 = vmax.f32 %v616_v6, 0.0  ;;  %v506_v13 = vpop.f32.mrb[12].mxu0  ;;  %v619_v22 = vpop.f32.mrb[12].mxu1 }
 0x102   : > { %2628 = vst [vmem:[%s3554_s5 + $0x500] sm:$0xff] %v2372_v8  ;;  %2630 = vst [vmem:[%s3554_s5 + $0x510] sm:$0xff] %v2374_v9  ;;  %v507_v14 = vadd.f32 %v506_v13, %v3640_v7  ;;  %v620_v15 = vadd.f32 %v619_v22, %v3640_v7  ;;  %v508_v16 = vpop.f32.mrb[13].mxu0  ;;  %v621_v18 = vpop.f32.mrb[13].mxu1  ;;  %2965 = vmatmul.mubr.msk.f32.gmra.mrb[118].mxu0 %vm314_vm1, %v3186_v25  ;;  %2975 = vmatmul.mubr.msk.f32.gmra.mrb[118].mxu1 %vm314_vm1, %v3186_v25 }
 0x103   : > { %2629 = vst [vmem:[%s3554_s5 + $0x508] sm:$0xff] %v2373_v10  ;;  %2631 = vst [vmem:[%s3554_s5 + $0x518] sm:$0xff] %v2375_v11  ;;  %v509_v19 = vadd.f32 %v508_v16, %v3640_v7  ;;  %v622_v20 = vadd.f32 %v621_v18, %v3640_v7  ;;  %2074 = vmatprep.mubr.f32.mxu0 %v3052_v0  ;;  %2187 = vmatprep.mubr.f32.mxu1 %v3052_v0 }
 0x104   : > { %v2404_v23 = vmax.f32 %v507_v14, 0.0  ;;  %v2406_v24 = vmax.f32 %v620_v15, 0.0 }
 0x105   : > { %v2405_v31 = vmax.f32 %v509_v19, 0.0  ;;  %v2407_v32 = vmax.f32 %v622_v20, 0.0  ;;  %v512_v33 = vpop.f32.mrb[14].mxu0  ;;  %v625_v25 = vpop.f32.mrb[14].mxu1 }
 0x106   : > { %2660 = vst [vmem:[%s3554_s5 + $0x600] sm:$0xff] %v2404_v23  ;;  %2662 = vst [vmem:[%s3554_s5 + $0x610] sm:$0xff] %v2406_v24  ;;  %v513_v34 = vadd.f32 %v512_v33, %v3656_v21  ;;  %v626_v35 = vadd.f32 %v625_v25, %v3656_v21  ;;  %v514_v36 = vpop.f32.mrb[15].mxu0  ;;  %v627_v37 = vpop.f32.mrb[15].mxu1  ;;  %2966 = vmatmul.mubr.msk.f32.gmra.mrb[120].mxu0 %vm314_vm1, %v3197_v26  ;;  %2976 = vmatmul.mubr.msk.f32.gmra.mrb[120].mxu1 %vm314_vm1, %v3197_v26 }
 0x107   : > { %2661 = vst [vmem:[%s3554_s5 + $0x608] sm:$0xff] %v2405_v31  ;;  %2663 = vst [vmem:[%s3554_s5 + $0x618] sm:$0xff] %v2407_v32  ;;  %v515_v38 = vadd.f32 %v514_v36, %v3656_v21  ;;  %v628_v39 = vadd.f32 %v627_v37, %v3656_v21  ;;  %2080 = vmatprep.mubr.f32.mxu0 %v3052_v0  ;;  %2193 = vmatprep.mubr.f32.mxu1 %v3052_v0 }
 0x108   : > { %v2436_v40 = vmax.f32 %v513_v34, 0.0  ;;  %v2438_v41 = vmax.f32 %v626_v35, 0.0 }
 0x109   : > { %v2437_v42 = vmax.f32 %v515_v38, 0.0  ;;  %v2439_v44 = vmax.f32 %v628_v39, 0.0  ;;  %v696_v45 = vpop.f32.mrb[16].mxu0  ;;  %v809_v46 = vpop.f32.mrb[16].mxu1 }
 0x10a   : > { %2692 = vst [vmem:[%s3554_s5 + $0x700] sm:$0xff] %v2436_v40  ;;  %2694 = vst [vmem:[%s3554_s5 + $0x710] sm:$0xff] %v2438_v41  ;;  %v697_v26 = vadd.f32 %v696_v45, %v3536_v50  ;;  %v810_v47 = vadd.f32 %v809_v46, %v3536_v50  ;;  %v698_v48 = vpop.f32.mrb[17].mxu0  ;;  %v811_v12 = vpop.f32.mrb[17].mxu1  ;;  %2967 = vmatmul.mubr.msk.f32.gmra.mrb[122].mxu0 %vm314_vm1, %v3208_v27  ;;  %2977 = vmatmul.mubr.msk.f32.gmra.mrb[122].mxu1 %vm314_vm1, %v3208_v27 }
 0x10b   : > { %2693 = vst [vmem:[%s3554_s5 + $0x708] sm:$0xff] %v2437_v42  ;;  %2695 = vst [vmem:[%s3554_s5 + $0x718] sm:$0xff] %v2439_v44  ;;  %v699_v49 = vadd.f32 %v698_v48, %v3536_v50  ;;  %v812_v51 = vadd.f32 %v811_v12, %v3536_v50  ;;  %2086 = vmatprep.mubr.f32.mxu0 %v3052_v0  ;;  %2199 = vmatprep.mubr.f32.mxu1 %v3052_v0 }
 0x10c   : > { %v2216_v52 = vmax.f32 %v697_v26, 0.0  ;;  %v2218_v53 = vmax.f32 %v810_v47, 0.0 }
 0x10d   : > { %v2217_v54 = vmax.f32 %v699_v49, 0.0  ;;  %v2219_v55 = vmax.f32 %v812_v51, 0.0  ;;  %v702_v57 = vpop.f32.mrb[18].mxu0  ;;  %v815_v58 = vpop.f32.mrb[18].mxu1 }
 0x10e   : > { %2472 = vst [vmem:[%s3554_s5 + $0x20] sm:$0xff] %v2216_v52  ;;  %2474 = vst [vmem:[%s3554_s5 + $0x30] sm:$0xff] %v2218_v53  ;;  %v703_v27 = vadd.f32 %v702_v57, %v3560_v59  ;;  %v816_v60 = vadd.f32 %v815_v58, %v3560_v59  ;;  %v704_v61 = vpop.f32.mrb[19].mxu0  ;;  %v817_v63 = vpop.f32.mrb[19].mxu1  ;;  %2968 = vmatmul.mubr.msk.f32.gmra.mrb[124].mxu0 %vm314_vm1, %v3219_v28  ;;  %2978 = vmatmul.mubr.msk.f32.gmra.mrb[124].mxu1 %vm314_vm1, %v3219_v28 }
 0x10f   : > { %2473 = vst [vmem:[%s3554_s5 + $0x28] sm:$0xff] %v2217_v54  ;;  %2475 = vst [vmem:[%s3554_s5 + $0x38] sm:$0xff] %v2219_v55  ;;  %v705_v17 = vadd.f32 %v704_v61, %v3560_v59  ;;  %v818_v1 = vadd.f32 %v817_v63, %v3560_v59  ;;  %2092 = vmatprep.mubr.f32.mxu0 %v3052_v0  ;;  %2205 = vmatprep.mubr.f32.mxu1 %v3052_v0 }
 0x110   : > { %v2248_v2 = vmax.f32 %v703_v27, 0.0  ;;  %v2250_v3 = vmax.f32 %v816_v60, 0.0 }
 0x111   : > { %v2249_v4 = vmax.f32 %v705_v17, 0.0  ;;  %v2251_v5 = vmax.f32 %v818_v1, 0.0  ;;  %v708_v6 = vpop.f32.mrb[20].mxu0  ;;  %v821_v8 = vpop.f32.mrb[20].mxu1 }
 0x112   : > { %2504 = vst [vmem:[%s3554_s5 + $0x120] sm:$0xff] %v2248_v2  ;;  %2506 = vst [vmem:[%s3554_s5 + $0x130] sm:$0xff] %v2250_v3  ;;  %v709_v28 = vadd.f32 %v708_v6, %v3562_v62  ;;  %v822_v9 = vadd.f32 %v821_v8, %v3562_v62  ;;  %v710_v10 = vpop.f32.mrb[21].mxu0  ;;  %v823_v11 = vpop.f32.mrb[21].mxu1  ;;  %2969 = vmatmul.mubr.msk.f32.gmra.mrb[126].mxu0 %vm314_vm1, %v3230_v29  ;;  %2979 = vmatmul.mubr.msk.f32.gmra.mrb[126].mxu1 %vm314_vm1, %v3230_v29 }
 0x113   : > { %2505 = vst [vmem:[%s3554_s5 + $0x128] sm:$0xff] %v2249_v4  ;;  %2507 = vst [vmem:[%s3554_s5 + $0x138] sm:$0xff] %v2251_v5  ;;  %v711_v0 = vadd.f32 %v710_v10, %v3562_v62  ;;  %v824_v13 = vadd.f32 %v823_v11, %v3562_v62 }
 0x114   : > { %v2280_v22 = vmax.f32 %v709_v28, 0.0  ;;  %v2282_v14 = vmax.f32 %v822_v9, 0.0 }
 0x115   : > { %v2281_v15 = vmax.f32 %v711_v0, 0.0  ;;  %v2283_v16 = vmax.f32 %v824_v13, 0.0  ;;  %v714_v18 = vpop.f32.mrb[22].mxu0  ;;  %v827_v19 = vpop.f32.mrb[22].mxu1 }
 0x116   : > { %2536 = vst [vmem:[%s3554_s5 + $0x220] sm:$0xff] %v2280_v22  ;;  %2538 = vst [vmem:[%s3554_s5 + $0x230] sm:$0xff] %v2282_v14  ;;  %v715_v29 = vadd.f32 %v714_v18, %v3592_v30  ;;  %v828_v20 = vadd.f32 %v827_v19, %v3592_v30  ;;  %v716_v23 = vpop.f32.mrb[23].mxu0  ;;  %v829_v24 = vpop.f32.mrb[23].mxu1 }
 0x117   : > { %2537 = vst [vmem:[%s3554_s5 + $0x228] sm:$0xff] %v2281_v15  ;;  %2539 = vst [vmem:[%s3554_s5 + $0x238] sm:$0xff] %v2283_v16  ;;  %v717_v31 = vadd.f32 %v716_v23, %v3592_v30  ;;  %v830_v32 = vadd.f32 %v829_v24, %v3592_v30 }
 0x118   : > { %v2312_v33 = vmax.f32 %v715_v29, 0.0  ;;  %v2314_v25 = vmax.f32 %v828_v20, 0.0 }
 0x119   : > { %v2313_v34 = vmax.f32 %v717_v31, 0.0  ;;  %v2315_v35 = vmax.f32 %v830_v32, 0.0  ;;  %v720_v36 = vpop.f32.mrb[24].mxu0  ;;  %v833_v37 = vpop.f32.mrb[24].mxu1 }
 0x11a   : > { %2568 = vst [vmem:[%s3554_s5 + $0x320] sm:$0xff] %v2312_v33  ;;  %2570 = vst [vmem:[%s3554_s5 + $0x330] sm:$0xff] %v2314_v25  ;;  %v721_v38 = vadd.f32 %v720_v36, %v3608_v43  ;;  %v834_v39 = vadd.f32 %v833_v37, %v3608_v43  ;;  %v722_v40 = vpop.f32.mrb[25].mxu0  ;;  %v835_v41 = vpop.f32.mrb[25].mxu1 }
 0x11b   : > { %2569 = vst [vmem:[%s3554_s5 + $0x328] sm:$0xff] %v2313_v34  ;;  %2571 = vst [vmem:[%s3554_s5 + $0x338] sm:$0xff] %v2315_v35  ;;  %v723_v42 = vadd.f32 %v722_v40, %v3608_v43  ;;  %v836_v44 = vadd.f32 %v835_v41, %v3608_v43 }
 0x11c   : > { %v2344_v45 = vmax.f32 %v721_v38, 0.0  ;;  %v2346_v46 = vmax.f32 %v834_v39, 0.0 }
 0x11d   : > { %v2345_v26 = vmax.f32 %v723_v42, 0.0  ;;  %v2347_v47 = vmax.f32 %v836_v44, 0.0  ;;  %v726_v48 = vpop.f32.mrb[26].mxu0  ;;  %v839_v12 = vpop.f32.mrb[26].mxu1 }
 0x11e   : > { %2600 = vst [vmem:[%s3554_s5 + $0x420] sm:$0xff] %v2344_v45  ;;  %2602 = vst [vmem:[%s3554_s5 + $0x430] sm:$0xff] %v2346_v46  ;;  %v727_v49 = vadd.f32 %v726_v48, %v3624_v56  ;;  %v840_v51 = vadd.f32 %v839_v12, %v3624_v56  ;;  %v728_v52 = vpop.f32.mrb[27].mxu0  ;;  %v841_v53 = vpop.f32.mrb[27].mxu1 }
 0x11f   : > { %2601 = vst [vmem:[%s3554_s5 + $0x428] sm:$0xff] %v2345_v26  ;;  %2603 = vst [vmem:[%s3554_s5 + $0x438] sm:$0xff] %v2347_v47  ;;  %v729_v54 = vadd.f32 %v728_v52, %v3624_v56  ;;  %v842_v55 = vadd.f32 %v841_v53, %v3624_v56 }
 0x120   : > { %v2376_v57 = vmax.f32 %v727_v49, 0.0  ;;  %v2378_v58 = vmax.f32 %v840_v51, 0.0 }
 0x121   : > { %v2377_v27 = vmax.f32 %v729_v54, 0.0  ;;  %v2379_v60 = vmax.f32 %v842_v55, 0.0  ;;  %v732_v61 = vpop.f32.mrb[28].mxu0  ;;  %v845_v63 = vpop.f32.mrb[28].mxu1 }
 0x122   : > { %2632 = vst [vmem:[%s3554_s5 + $0x520] sm:$0xff] %v2376_v57  ;;  %2634 = vst [vmem:[%s3554_s5 + $0x530] sm:$0xff] %v2378_v58  ;;  %v733_v17 = vadd.f32 %v732_v61, %v3640_v7  ;;  %v846_v1 = vadd.f32 %v845_v63, %v3640_v7  ;;  %v734_v2 = vpop.f32.mrb[29].mxu0  ;;  %v847_v3 = vpop.f32.mrb[29].mxu1 }
 0x123   : > { %2633 = vst [vmem:[%s3554_s5 + $0x528] sm:$0xff] %v2377_v27  ;;  %2635 = vst [vmem:[%s3554_s5 + $0x538] sm:$0xff] %v2379_v60  ;;  %v735_v4 = vadd.f32 %v734_v2, %v3640_v7  ;;  %v848_v5 = vadd.f32 %v847_v3, %v3640_v7 }
 0x124   : > { %v2408_v6 = vmax.f32 %v733_v17, 0.0  ;;  %v2410_v8 = vmax.f32 %v846_v1, 0.0 }
 0x125   : > { %v2409_v28 = vmax.f32 %v735_v4, 0.0  ;;  %v2411_v9 = vmax.f32 %v848_v5, 0.0  ;;  %v738_v10 = vpop.f32.mrb[30].mxu0  ;;  %v851_v11 = vpop.f32.mrb[30].mxu1 }
 0x126   : > { %2664 = vst [vmem:[%s3554_s5 + $0x620] sm:$0xff] %v2408_v6  ;;  %2666 = vst [vmem:[%s3554_s5 + $0x630] sm:$0xff] %v2410_v8  ;;  %v739_v0 = vadd.f32 %v738_v10, %v3656_v21  ;;  %v852_v13 = vadd.f32 %v851_v11, %v3656_v21  ;;  %v740_v22 = vpop.f32.mrb[31].mxu0  ;;  %v853_v14 = vpop.f32.mrb[31].mxu1 }
 0x127   : > { %2665 = vst [vmem:[%s3554_s5 + $0x628] sm:$0xff] %v2409_v28  ;;  %2667 = vst [vmem:[%s3554_s5 + $0x638] sm:$0xff] %v2411_v9  ;;  %v741_v15 = vadd.f32 %v740_v22, %v3656_v21  ;;  %v854_v16 = vadd.f32 %v853_v14, %v3656_v21 }
 0x128   : > { %v2440_v18 = vmax.f32 %v739_v0, 0.0  ;;  %v2442_v19 = vmax.f32 %v852_v13, 0.0 }
 0x129   : > { %v2441_v29 = vmax.f32 %v741_v15, 0.0  ;;  %v2443_v20 = vmax.f32 %v854_v16, 0.0  ;;  %v922_v23 = vpop.f32.mrb[32].mxu0  ;;  %v1035_v24 = vpop.f32.mrb[32].mxu1 }
 0x12a   : > { %2696 = vst [vmem:[%s3554_s5 + $0x720] sm:$0xff] %v2440_v18  ;;  %2698 = vst [vmem:[%s3554_s5 + $0x730] sm:$0xff] %v2442_v19  ;;  %v923_v31 = vadd.f32 %v922_v23, %v3536_v50  ;;  %v1036_v32 = vadd.f32 %v1035_v24, %v3536_v50  ;;  %v924_v33 = vpop.f32.mrb[33].mxu0  ;;  %v1037_v25 = vpop.f32.mrb[33].mxu1 }
 0x12b   : > { %2697 = vst [vmem:[%s3554_s5 + $0x728] sm:$0xff] %v2441_v29  ;;  %2699 = vst [vmem:[%s3554_s5 + $0x738] sm:$0xff] %v2443_v20  ;;  %v925_v34 = vadd.f32 %v924_v33, %v3536_v50  ;;  %v1038_v35 = vadd.f32 %v1037_v25, %v3536_v50 }
 0x12c   : > { %v2220_v36 = vmax.f32 %v923_v31, 0.0  ;;  %v2222_v37 = vmax.f32 %v1036_v32, 0.0 }
 0x12d   : > { %v2221_v38 = vmax.f32 %v925_v34, 0.0  ;;  %v2223_v39 = vmax.f32 %v1038_v35, 0.0  ;;  %v928_v40 = vpop.f32.mrb[34].mxu0  ;;  %v1041_v41 = vpop.f32.mrb[34].mxu1 }
 0x12e   : > { %2476 = vst [vmem:[%s3554_s5 + $0x40] sm:$0xff] %v2220_v36  ;;  %2478 = vst [vmem:[%s3554_s5 + $0x50] sm:$0xff] %v2222_v37  ;;  %v929_v42 = vadd.f32 %v928_v40, %v3560_v59  ;;  %v1042_v44 = vadd.f32 %v1041_v41, %v3560_v59  ;;  %v930_v45 = vpop.f32.mrb[35].mxu0  ;;  %v1043_v46 = vpop.f32.mrb[35].mxu1 }
 0x12f   : > { %2477 = vst [vmem:[%s3554_s5 + $0x48] sm:$0xff] %v2221_v38  ;;  %2479 = vst [vmem:[%s3554_s5 + $0x58] sm:$0xff] %v2223_v39  ;;  %v931_v26 = vadd.f32 %v930_v45, %v3560_v59  ;;  %v1044_v47 = vadd.f32 %v1043_v46, %v3560_v59 }
 0x130   : > { %v2252_v48 = vmax.f32 %v929_v42, 0.0  ;;  %v2254_v12 = vmax.f32 %v1042_v44, 0.0 }
 0x131   : > { %v2253_v49 = vmax.f32 %v931_v26, 0.0  ;;  %v2255_v51 = vmax.f32 %v1044_v47, 0.0  ;;  %v934_v52 = vpop.f32.mrb[36].mxu0  ;;  %v1047_v53 = vpop.f32.mrb[36].mxu1 }
 0x132   : > { %2508 = vst [vmem:[%s3554_s5 + $0x140] sm:$0xff] %v2252_v48  ;;  %2510 = vst [vmem:[%s3554_s5 + $0x150] sm:$0xff] %v2254_v12  ;;  %v935_v54 = vadd.f32 %v934_v52, %v3562_v62  ;;  %v1048_v55 = vadd.f32 %v1047_v53, %v3562_v62  ;;  %v936_v57 = vpop.f32.mrb[37].mxu0  ;;  %v1049_v58 = vpop.f32.mrb[37].mxu1 }
 0x133   : > { %2509 = vst [vmem:[%s3554_s5 + $0x148] sm:$0xff] %v2253_v49  ;;  %2511 = vst [vmem:[%s3554_s5 + $0x158] sm:$0xff] %v2255_v51  ;;  %v937_v27 = vadd.f32 %v936_v57, %v3562_v62  ;;  %v1050_v60 = vadd.f32 %v1049_v58, %v3562_v62 }
 0x134   : > { %v2284_v61 = vmax.f32 %v935_v54, 0.0  ;;  %v2286_v63 = vmax.f32 %v1048_v55, 0.0 }
 0x135   : > { %v2285_v17 = vmax.f32 %v937_v27, 0.0  ;;  %v2287_v1 = vmax.f32 %v1050_v60, 0.0  ;;  %v940_v2 = vpop.f32.mrb[38].mxu0  ;;  %v1053_v3 = vpop.f32.mrb[38].mxu1 }
 0x136   : > { %2540 = vst [vmem:[%s3554_s5 + $0x240] sm:$0xff] %v2284_v61  ;;  %2542 = vst [vmem:[%s3554_s5 + $0x250] sm:$0xff] %v2286_v63  ;;  %v941_v4 = vadd.f32 %v940_v2, %v3592_v30  ;;  %v1054_v5 = vadd.f32 %v1053_v3, %v3592_v30  ;;  %v942_v6 = vpop.f32.mrb[39].mxu0  ;;  %v1055_v8 = vpop.f32.mrb[39].mxu1 }
 0x137   : > { %2541 = vst [vmem:[%s3554_s5 + $0x248] sm:$0xff] %v2285_v17  ;;  %2543 = vst [vmem:[%s3554_s5 + $0x258] sm:$0xff] %v2287_v1  ;;  %v943_v28 = vadd.f32 %v942_v6, %v3592_v30  ;;  %v1056_v9 = vadd.f32 %v1055_v8, %v3592_v30 }
 0x138   : > { %v2316_v10 = vmax.f32 %v941_v4, 0.0  ;;  %v2318_v11 = vmax.f32 %v1054_v5, 0.0 }
 0x139   : > { %v2317_v0 = vmax.f32 %v943_v28, 0.0  ;;  %v2319_v13 = vmax.f32 %v1056_v9, 0.0  ;;  %v946_v22 = vpop.f32.mrb[40].mxu0  ;;  %v1059_v14 = vpop.f32.mrb[40].mxu1 }
 0x13a   : > { %2572 = vst [vmem:[%s3554_s5 + $0x340] sm:$0xff] %v2316_v10  ;;  %2574 = vst [vmem:[%s3554_s5 + $0x350] sm:$0xff] %v2318_v11  ;;  %v947_v15 = vadd.f32 %v946_v22, %v3608_v43  ;;  %v1060_v16 = vadd.f32 %v1059_v14, %v3608_v43  ;;  %v948_v18 = vpop.f32.mrb[41].mxu0  ;;  %v1061_v19 = vpop.f32.mrb[41].mxu1 }
 0x13b   : > { %2573 = vst [vmem:[%s3554_s5 + $0x348] sm:$0xff] %v2317_v0  ;;  %2575 = vst [vmem:[%s3554_s5 + $0x358] sm:$0xff] %v2319_v13  ;;  %v949_v29 = vadd.f32 %v948_v18, %v3608_v43  ;;  %v1062_v20 = vadd.f32 %v1061_v19, %v3608_v43 }
 0x13c   : > { %v2348_v23 = vmax.f32 %v947_v15, 0.0  ;;  %v2350_v24 = vmax.f32 %v1060_v16, 0.0 }
 0x13d   : > { %v2349_v31 = vmax.f32 %v949_v29, 0.0  ;;  %v2351_v32 = vmax.f32 %v1062_v20, 0.0  ;;  %v952_v33 = vpop.f32.mrb[42].mxu0  ;;  %v1065_v25 = vpop.f32.mrb[42].mxu1 }
 0x13e   : > { %2604 = vst [vmem:[%s3554_s5 + $0x440] sm:$0xff] %v2348_v23  ;;  %2606 = vst [vmem:[%s3554_s5 + $0x450] sm:$0xff] %v2350_v24  ;;  %v953_v34 = vadd.f32 %v952_v33, %v3624_v56  ;;  %v1066_v35 = vadd.f32 %v1065_v25, %v3624_v56  ;;  %v954_v36 = vpop.f32.mrb[43].mxu0  ;;  %v1067_v37 = vpop.f32.mrb[43].mxu1 }
 0x13f   : > { %2605 = vst [vmem:[%s3554_s5 + $0x448] sm:$0xff] %v2349_v31  ;;  %2607 = vst [vmem:[%s3554_s5 + $0x458] sm:$0xff] %v2351_v32  ;;  %v955_v38 = vadd.f32 %v954_v36, %v3624_v56  ;;  %v1068_v39 = vadd.f32 %v1067_v37, %v3624_v56 }
 0x140   : > { %v2380_v40 = vmax.f32 %v953_v34, 0.0  ;;  %v2382_v41 = vmax.f32 %v1066_v35, 0.0 }
 0x141   : > { %v2381_v42 = vmax.f32 %v955_v38, 0.0  ;;  %v2383_v44 = vmax.f32 %v1068_v39, 0.0  ;;  %v958_v45 = vpop.f32.mrb[44].mxu0  ;;  %v1071_v46 = vpop.f32.mrb[44].mxu1 }
 0x142   : > { %2636 = vst [vmem:[%s3554_s5 + $0x540] sm:$0xff] %v2380_v40  ;;  %2638 = vst [vmem:[%s3554_s5 + $0x550] sm:$0xff] %v2382_v41  ;;  %v959_v26 = vadd.f32 %v958_v45, %v3640_v7  ;;  %v1072_v47 = vadd.f32 %v1071_v46, %v3640_v7  ;;  %v960_v48 = vpop.f32.mrb[45].mxu0  ;;  %v1073_v12 = vpop.f32.mrb[45].mxu1 }
 0x143   : > { %2637 = vst [vmem:[%s3554_s5 + $0x548] sm:$0xff] %v2381_v42  ;;  %2639 = vst [vmem:[%s3554_s5 + $0x558] sm:$0xff] %v2383_v44  ;;  %v961_v49 = vadd.f32 %v960_v48, %v3640_v7  ;;  %v1074_v51 = vadd.f32 %v1073_v12, %v3640_v7 }
 0x144   : > { %v2412_v52 = vmax.f32 %v959_v26, 0.0  ;;  %v2414_v53 = vmax.f32 %v1072_v47, 0.0 }
 0x145   : > { %v2413_v54 = vmax.f32 %v961_v49, 0.0  ;;  %v2415_v55 = vmax.f32 %v1074_v51, 0.0  ;;  %v964_v57 = vpop.f32.mrb[46].mxu0  ;;  %v1077_v58 = vpop.f32.mrb[46].mxu1 }
 0x146   : > { %2668 = vst [vmem:[%s3554_s5 + $0x640] sm:$0xff] %v2412_v52  ;;  %2670 = vst [vmem:[%s3554_s5 + $0x650] sm:$0xff] %v2414_v53  ;;  %v965_v27 = vadd.f32 %v964_v57, %v3656_v21  ;;  %v1078_v60 = vadd.f32 %v1077_v58, %v3656_v21  ;;  %v966_v61 = vpop.f32.mrb[47].mxu0  ;;  %v1079_v63 = vpop.f32.mrb[47].mxu1 }
 0x147   : > { %2669 = vst [vmem:[%s3554_s5 + $0x648] sm:$0xff] %v2413_v54  ;;  %2671 = vst [vmem:[%s3554_s5 + $0x658] sm:$0xff] %v2415_v55  ;;  %v967_v17 = vadd.f32 %v966_v61, %v3656_v21  ;;  %v1080_v1 = vadd.f32 %v1079_v63, %v3656_v21 }
 0x148   : > { %v2444_v2 = vmax.f32 %v965_v27, 0.0  ;;  %v2446_v3 = vmax.f32 %v1078_v60, 0.0 }
 0x149   : > { %v2445_v4 = vmax.f32 %v967_v17, 0.0  ;;  %v2447_v5 = vmax.f32 %v1080_v1, 0.0  ;;  %v1148_v6 = vpop.f32.mrb[48].mxu0  ;;  %v1261_v8 = vpop.f32.mrb[48].mxu1 }
 0x14a   : > { %2700 = vst [vmem:[%s3554_s5 + $0x740] sm:$0xff] %v2444_v2  ;;  %2702 = vst [vmem:[%s3554_s5 + $0x750] sm:$0xff] %v2446_v3  ;;  %v1149_v28 = vadd.f32 %v1148_v6, %v3536_v50  ;;  %v1262_v9 = vadd.f32 %v1261_v8, %v3536_v50  ;;  %v1150_v10 = vpop.f32.mrb[49].mxu0  ;;  %v1263_v11 = vpop.f32.mrb[49].mxu1 }
 0x14b   : > { %2701 = vst [vmem:[%s3554_s5 + $0x748] sm:$0xff] %v2445_v4  ;;  %2703 = vst [vmem:[%s3554_s5 + $0x758] sm:$0xff] %v2447_v5  ;;  %v1151_v0 = vadd.f32 %v1150_v10, %v3536_v50  ;;  %v1264_v13 = vadd.f32 %v1263_v11, %v3536_v50 }
 0x14c   : > { %v2224_v22 = vmax.f32 %v1149_v28, 0.0  ;;  %v2226_v14 = vmax.f32 %v1262_v9, 0.0 }
 0x14d   : > { %v2225_v15 = vmax.f32 %v1151_v0, 0.0  ;;  %v2227_v16 = vmax.f32 %v1264_v13, 0.0  ;;  %v1154_v18 = vpop.f32.mrb[50].mxu0  ;;  %v1267_v19 = vpop.f32.mrb[50].mxu1 }
 0x14e   : > { %2480 = vst [vmem:[%s3554_s5 + $0x60] sm:$0xff] %v2224_v22  ;;  %2482 = vst [vmem:[%s3554_s5 + $0x70] sm:$0xff] %v2226_v14  ;;  %v1155_v29 = vadd.f32 %v1154_v18, %v3560_v59  ;;  %v1268_v20 = vadd.f32 %v1267_v19, %v3560_v59  ;;  %v1156_v23 = vpop.f32.mrb[51].mxu0  ;;  %v1269_v24 = vpop.f32.mrb[51].mxu1 }
 0x14f   : > { %2481 = vst [vmem:[%s3554_s5 + $0x68] sm:$0xff] %v2225_v15  ;;  %2483 = vst [vmem:[%s3554_s5 + $0x78] sm:$0xff] %v2227_v16  ;;  %v1157_v31 = vadd.f32 %v1156_v23, %v3560_v59  ;;  %v1270_v32 = vadd.f32 %v1269_v24, %v3560_v59 }
 0x150   : > { %v2256_v33 = vmax.f32 %v1155_v29, 0.0  ;;  %v2258_v25 = vmax.f32 %v1268_v20, 0.0 }
 0x151   : > { %v2257_v34 = vmax.f32 %v1157_v31, 0.0  ;;  %v2259_v35 = vmax.f32 %v1270_v32, 0.0  ;;  %v1160_v36 = vpop.f32.mrb[52].mxu0  ;;  %v1273_v37 = vpop.f32.mrb[52].mxu1 }
 0x152   : > { %2512 = vst [vmem:[%s3554_s5 + $0x160] sm:$0xff] %v2256_v33  ;;  %2514 = vst [vmem:[%s3554_s5 + $0x170] sm:$0xff] %v2258_v25  ;;  %v1161_v38 = vadd.f32 %v1160_v36, %v3562_v62  ;;  %v1274_v39 = vadd.f32 %v1273_v37, %v3562_v62  ;;  %v1162_v40 = vpop.f32.mrb[53].mxu0  ;;  %v1275_v41 = vpop.f32.mrb[53].mxu1 }
 0x153   : > { %2513 = vst [vmem:[%s3554_s5 + $0x168] sm:$0xff] %v2257_v34  ;;  %2515 = vst [vmem:[%s3554_s5 + $0x178] sm:$0xff] %v2259_v35  ;;  %v1163_v42 = vadd.f32 %v1162_v40, %v3562_v62  ;;  %v1276_v44 = vadd.f32 %v1275_v41, %v3562_v62 }
 0x154   : > { %v2288_v45 = vmax.f32 %v1161_v38, 0.0  ;;  %v2290_v46 = vmax.f32 %v1274_v39, 0.0 }
 0x155   : > { %v2289_v26 = vmax.f32 %v1163_v42, 0.0  ;;  %v2291_v47 = vmax.f32 %v1276_v44, 0.0  ;;  %v1166_v48 = vpop.f32.mrb[54].mxu0  ;;  %v1279_v12 = vpop.f32.mrb[54].mxu1 }
 0x156   : > { %2544 = vst [vmem:[%s3554_s5 + $0x260] sm:$0xff] %v2288_v45  ;;  %2546 = vst [vmem:[%s3554_s5 + $0x270] sm:$0xff] %v2290_v46  ;;  %v1167_v49 = vadd.f32 %v1166_v48, %v3592_v30  ;;  %v1280_v51 = vadd.f32 %v1279_v12, %v3592_v30  ;;  %v1168_v52 = vpop.f32.mrb[55].mxu0  ;;  %v1281_v53 = vpop.f32.mrb[55].mxu1 }
 0x157   : > { %2545 = vst [vmem:[%s3554_s5 + $0x268] sm:$0xff] %v2289_v26  ;;  %2547 = vst [vmem:[%s3554_s5 + $0x278] sm:$0xff] %v2291_v47  ;;  %v1169_v54 = vadd.f32 %v1168_v52, %v3592_v30  ;;  %v1282_v55 = vadd.f32 %v1281_v53, %v3592_v30 }
 0x158   : > { %v2320_v57 = vmax.f32 %v1167_v49, 0.0  ;;  %v2322_v58 = vmax.f32 %v1280_v51, 0.0 }
 0x159   : > { %v2321_v27 = vmax.f32 %v1169_v54, 0.0  ;;  %v2323_v60 = vmax.f32 %v1282_v55, 0.0  ;;  %v1172_v61 = vpop.f32.mrb[56].mxu0  ;;  %v1285_v63 = vpop.f32.mrb[56].mxu1 }
 0x15a   : > { %2576 = vst [vmem:[%s3554_s5 + $0x360] sm:$0xff] %v2320_v57  ;;  %2578 = vst [vmem:[%s3554_s5 + $0x370] sm:$0xff] %v2322_v58  ;;  %v1173_v17 = vadd.f32 %v1172_v61, %v3608_v43  ;;  %v1286_v1 = vadd.f32 %v1285_v63, %v3608_v43  ;;  %v1174_v2 = vpop.f32.mrb[57].mxu0  ;;  %v1287_v3 = vpop.f32.mrb[57].mxu1 }
 0x15b   : > { %2577 = vst [vmem:[%s3554_s5 + $0x368] sm:$0xff] %v2321_v27  ;;  %2579 = vst [vmem:[%s3554_s5 + $0x378] sm:$0xff] %v2323_v60  ;;  %v1175_v4 = vadd.f32 %v1174_v2, %v3608_v43  ;;  %v1288_v5 = vadd.f32 %v1287_v3, %v3608_v43 }
 0x15c   : > { %v2352_v6 = vmax.f32 %v1173_v17, 0.0  ;;  %v2354_v8 = vmax.f32 %v1286_v1, 0.0 }
 0x15d   : > { %v2353_v28 = vmax.f32 %v1175_v4, 0.0  ;;  %v2355_v9 = vmax.f32 %v1288_v5, 0.0  ;;  %v1178_v10 = vpop.f32.mrb[58].mxu0  ;;  %v1291_v11 = vpop.f32.mrb[58].mxu1 }
 0x15e   : > { %2608 = vst [vmem:[%s3554_s5 + $0x460] sm:$0xff] %v2352_v6  ;;  %2610 = vst [vmem:[%s3554_s5 + $0x470] sm:$0xff] %v2354_v8  ;;  %v1179_v0 = vadd.f32 %v1178_v10, %v3624_v56  ;;  %v1292_v13 = vadd.f32 %v1291_v11, %v3624_v56  ;;  %v1180_v22 = vpop.f32.mrb[59].mxu0  ;;  %v1293_v14 = vpop.f32.mrb[59].mxu1 }
 0x15f   : > { %2609 = vst [vmem:[%s3554_s5 + $0x468] sm:$0xff] %v2353_v28  ;;  %2611 = vst [vmem:[%s3554_s5 + $0x478] sm:$0xff] %v2355_v9  ;;  %v1181_v15 = vadd.f32 %v1180_v22, %v3624_v56  ;;  %v1294_v16 = vadd.f32 %v1293_v14, %v3624_v56 }
 0x160   : > { %v2384_v18 = vmax.f32 %v1179_v0, 0.0  ;;  %v2386_v19 = vmax.f32 %v1292_v13, 0.0 }
 0x161   : > { %v2385_v29 = vmax.f32 %v1181_v15, 0.0  ;;  %v2387_v20 = vmax.f32 %v1294_v16, 0.0  ;;  %v1184_v23 = vpop.f32.mrb[60].mxu0  ;;  %v1297_v24 = vpop.f32.mrb[60].mxu1 }
 0x162   : > { %2640 = vst [vmem:[%s3554_s5 + $0x560] sm:$0xff] %v2384_v18  ;;  %2642 = vst [vmem:[%s3554_s5 + $0x570] sm:$0xff] %v2386_v19  ;;  %v1185_v31 = vadd.f32 %v1184_v23, %v3640_v7  ;;  %v1298_v32 = vadd.f32 %v1297_v24, %v3640_v7  ;;  %v1186_v33 = vpop.f32.mrb[61].mxu0  ;;  %v1299_v25 = vpop.f32.mrb[61].mxu1 }
 0x163   : > { %2641 = vst [vmem:[%s3554_s5 + $0x568] sm:$0xff] %v2385_v29  ;;  %2643 = vst [vmem:[%s3554_s5 + $0x578] sm:$0xff] %v2387_v20  ;;  %v1187_v34 = vadd.f32 %v1186_v33, %v3640_v7  ;;  %v1300_v35 = vadd.f32 %v1299_v25, %v3640_v7 }
 0x164   : > { %v2416_v36 = vmax.f32 %v1185_v31, 0.0  ;;  %v2418_v37 = vmax.f32 %v1298_v32, 0.0 }
 0x165   : > { %v2417_v38 = vmax.f32 %v1187_v34, 0.0  ;;  %v2419_v39 = vmax.f32 %v1300_v35, 0.0  ;;  %v1190_v40 = vpop.f32.mrb[62].mxu0  ;;  %v1303_v41 = vpop.f32.mrb[62].mxu1 }
 0x166   : > { %2672 = vst [vmem:[%s3554_s5 + $0x660] sm:$0xff] %v2416_v36  ;;  %2674 = vst [vmem:[%s3554_s5 + $0x670] sm:$0xff] %v2418_v37  ;;  %v1191_v42 = vadd.f32 %v1190_v40, %v3656_v21  ;;  %v1304_v44 = vadd.f32 %v1303_v41, %v3656_v21  ;;  %v1192_v45 = vpop.f32.mrb[63].mxu0  ;;  %v1305_v46 = vpop.f32.mrb[63].mxu1 }
 0x167   : > { %2673 = vst [vmem:[%s3554_s5 + $0x668] sm:$0xff] %v2417_v38  ;;  %2675 = vst [vmem:[%s3554_s5 + $0x678] sm:$0xff] %v2419_v39  ;;  %v1193_v26 = vadd.f32 %v1192_v45, %v3656_v21  ;;  %v1306_v47 = vadd.f32 %v1305_v46, %v3656_v21 }
 0x168   : > { %v2448_v48 = vmax.f32 %v1191_v42, 0.0  ;;  %v2450_v12 = vmax.f32 %v1304_v44, 0.0 }
 0x169   : > { %v2449_v49 = vmax.f32 %v1193_v26, 0.0  ;;  %v2451_v51 = vmax.f32 %v1306_v47, 0.0  ;;  %v1374_v52 = vpop.f32.mrb[64].mxu0  ;;  %v1487_v53 = vpop.f32.mrb[64].mxu1 }
 0x16a   : > { %2704 = vst [vmem:[%s3554_s5 + $0x760] sm:$0xff] %v2448_v48  ;;  %2706 = vst [vmem:[%s3554_s5 + $0x770] sm:$0xff] %v2450_v12  ;;  %v1375_v54 = vadd.f32 %v1374_v52, %v3536_v50  ;;  %v1488_v55 = vadd.f32 %v1487_v53, %v3536_v50  ;;  %v1376_v57 = vpop.f32.mrb[65].mxu0  ;;  %v1489_v58 = vpop.f32.mrb[65].mxu1 }
 0x16b   : > { %2705 = vst [vmem:[%s3554_s5 + $0x768] sm:$0xff] %v2449_v49  ;;  %2707 = vst [vmem:[%s3554_s5 + $0x778] sm:$0xff] %v2451_v51  ;;  %v1377_v27 = vadd.f32 %v1376_v57, %v3536_v50  ;;  %v1490_v60 = vadd.f32 %v1489_v58, %v3536_v50 }
 0x16c   : > { %v2228_v61 = vmax.f32 %v1375_v54, 0.0  ;;  %v2230_v63 = vmax.f32 %v1488_v55, 0.0 }
 0x16d   : > { %v2229_v17 = vmax.f32 %v1377_v27, 0.0  ;;  %v2231_v1 = vmax.f32 %v1490_v60, 0.0  ;;  %v1380_v2 = vpop.f32.mrb[66].mxu0  ;;  %v1493_v3 = vpop.f32.mrb[66].mxu1 }
 0x16e   : > { %2484 = vst [vmem:[%s3554_s5 + $0x80] sm:$0xff] %v2228_v61  ;;  %2486 = vst [vmem:[%s3554_s5 + $0x90] sm:$0xff] %v2230_v63  ;;  %v1381_v4 = vadd.f32 %v1380_v2, %v3560_v59  ;;  %v1494_v5 = vadd.f32 %v1493_v3, %v3560_v59  ;;  %v1382_v6 = vpop.f32.mrb[67].mxu0  ;;  %v1495_v8 = vpop.f32.mrb[67].mxu1 }
 0x16f   : > { %2485 = vst [vmem:[%s3554_s5 + $0x88] sm:$0xff] %v2229_v17  ;;  %2487 = vst [vmem:[%s3554_s5 + $0x98] sm:$0xff] %v2231_v1  ;;  %v1383_v28 = vadd.f32 %v1382_v6, %v3560_v59  ;;  %v1496_v9 = vadd.f32 %v1495_v8, %v3560_v59 }
 0x170   : > { %v2260_v10 = vmax.f32 %v1381_v4, 0.0  ;;  %v2262_v11 = vmax.f32 %v1494_v5, 0.0 }
 0x171   : > { %v2261_v0 = vmax.f32 %v1383_v28, 0.0  ;;  %v2263_v13 = vmax.f32 %v1496_v9, 0.0  ;;  %v1386_v22 = vpop.f32.mrb[68].mxu0  ;;  %v1499_v14 = vpop.f32.mrb[68].mxu1 }
 0x172   : > { %2516 = vst [vmem:[%s3554_s5 + $0x180] sm:$0xff] %v2260_v10  ;;  %2518 = vst [vmem:[%s3554_s5 + $0x190] sm:$0xff] %v2262_v11  ;;  %v1387_v15 = vadd.f32 %v1386_v22, %v3562_v62  ;;  %v1500_v16 = vadd.f32 %v1499_v14, %v3562_v62  ;;  %v1388_v18 = vpop.f32.mrb[69].mxu0  ;;  %v1501_v19 = vpop.f32.mrb[69].mxu1 }
 0x173   : > { %2517 = vst [vmem:[%s3554_s5 + $0x188] sm:$0xff] %v2261_v0  ;;  %2519 = vst [vmem:[%s3554_s5 + $0x198] sm:$0xff] %v2263_v13  ;;  %v1389_v29 = vadd.f32 %v1388_v18, %v3562_v62  ;;  %v1502_v20 = vadd.f32 %v1501_v19, %v3562_v62 }
 0x174   : > { %v2292_v23 = vmax.f32 %v1387_v15, 0.0  ;;  %v2294_v24 = vmax.f32 %v1500_v16, 0.0 }
 0x175   : > { %v2293_v31 = vmax.f32 %v1389_v29, 0.0  ;;  %v2295_v32 = vmax.f32 %v1502_v20, 0.0  ;;  %v1392_v33 = vpop.f32.mrb[70].mxu0  ;;  %v1505_v25 = vpop.f32.mrb[70].mxu1 }
 0x176   : > { %2548 = vst [vmem:[%s3554_s5 + $0x280] sm:$0xff] %v2292_v23  ;;  %2550 = vst [vmem:[%s3554_s5 + $0x290] sm:$0xff] %v2294_v24  ;;  %v1393_v34 = vadd.f32 %v1392_v33, %v3592_v30  ;;  %v1506_v35 = vadd.f32 %v1505_v25, %v3592_v30  ;;  %v1394_v36 = vpop.f32.mrb[71].mxu0  ;;  %v1507_v37 = vpop.f32.mrb[71].mxu1 }
 0x177   : > { %2549 = vst [vmem:[%s3554_s5 + $0x288] sm:$0xff] %v2293_v31  ;;  %2551 = vst [vmem:[%s3554_s5 + $0x298] sm:$0xff] %v2295_v32  ;;  %v1395_v38 = vadd.f32 %v1394_v36, %v3592_v30  ;;  %v1508_v39 = vadd.f32 %v1507_v37, %v3592_v30 }
 0x178   : > { %v2324_v40 = vmax.f32 %v1393_v34, 0.0  ;;  %v2326_v41 = vmax.f32 %v1506_v35, 0.0 }
 0x179   : > { %v2325_v42 = vmax.f32 %v1395_v38, 0.0  ;;  %v2327_v44 = vmax.f32 %v1508_v39, 0.0  ;;  %v1398_v45 = vpop.f32.mrb[72].mxu0  ;;  %v1511_v46 = vpop.f32.mrb[72].mxu1 }
 0x17a   : > { %2580 = vst [vmem:[%s3554_s5 + $0x380] sm:$0xff] %v2324_v40  ;;  %2582 = vst [vmem:[%s3554_s5 + $0x390] sm:$0xff] %v2326_v41  ;;  %v1399_v26 = vadd.f32 %v1398_v45, %v3608_v43  ;;  %v1512_v47 = vadd.f32 %v1511_v46, %v3608_v43  ;;  %v1400_v48 = vpop.f32.mrb[73].mxu0  ;;  %v1513_v12 = vpop.f32.mrb[73].mxu1 }
 0x17b   : > { %2581 = vst [vmem:[%s3554_s5 + $0x388] sm:$0xff] %v2325_v42  ;;  %2583 = vst [vmem:[%s3554_s5 + $0x398] sm:$0xff] %v2327_v44  ;;  %v1401_v49 = vadd.f32 %v1400_v48, %v3608_v43  ;;  %v1514_v51 = vadd.f32 %v1513_v12, %v3608_v43 }
 0x17c   : > { %v2356_v52 = vmax.f32 %v1399_v26, 0.0  ;;  %v2358_v53 = vmax.f32 %v1512_v47, 0.0 }
 0x17d   : > { %v2357_v54 = vmax.f32 %v1401_v49, 0.0  ;;  %v2359_v55 = vmax.f32 %v1514_v51, 0.0  ;;  %v1404_v57 = vpop.f32.mrb[74].mxu0  ;;  %v1517_v58 = vpop.f32.mrb[74].mxu1 }
 0x17e   : > { %2612 = vst [vmem:[%s3554_s5 + $0x480] sm:$0xff] %v2356_v52  ;;  %2614 = vst [vmem:[%s3554_s5 + $0x490] sm:$0xff] %v2358_v53  ;;  %v1405_v27 = vadd.f32 %v1404_v57, %v3624_v56  ;;  %v1518_v60 = vadd.f32 %v1517_v58, %v3624_v56  ;;  %v1406_v61 = vpop.f32.mrb[75].mxu0  ;;  %v1519_v63 = vpop.f32.mrb[75].mxu1 }
 0x17f   : > { %2613 = vst [vmem:[%s3554_s5 + $0x488] sm:$0xff] %v2357_v54  ;;  %2615 = vst [vmem:[%s3554_s5 + $0x498] sm:$0xff] %v2359_v55  ;;  %v1407_v17 = vadd.f32 %v1406_v61, %v3624_v56  ;;  %v1520_v1 = vadd.f32 %v1519_v63, %v3624_v56 }
 0x180   : > { %v2388_v2 = vmax.f32 %v1405_v27, 0.0  ;;  %v2390_v3 = vmax.f32 %v1518_v60, 0.0 }
 0x181   : > { %v2389_v4 = vmax.f32 %v1407_v17, 0.0  ;;  %v2391_v5 = vmax.f32 %v1520_v1, 0.0  ;;  %v1410_v6 = vpop.f32.mrb[76].mxu0  ;;  %v1523_v8 = vpop.f32.mrb[76].mxu1 }
 0x182   : > { %2644 = vst [vmem:[%s3554_s5 + $0x580] sm:$0xff] %v2388_v2  ;;  %2646 = vst [vmem:[%s3554_s5 + $0x590] sm:$0xff] %v2390_v3  ;;  %v1411_v28 = vadd.f32 %v1410_v6, %v3640_v7  ;;  %v1524_v9 = vadd.f32 %v1523_v8, %v3640_v7  ;;  %v1412_v10 = vpop.f32.mrb[77].mxu0  ;;  %v1525_v11 = vpop.f32.mrb[77].mxu1 }
 0x183   : > { %2645 = vst [vmem:[%s3554_s5 + $0x588] sm:$0xff] %v2389_v4  ;;  %2647 = vst [vmem:[%s3554_s5 + $0x598] sm:$0xff] %v2391_v5  ;;  %v1413_v0 = vadd.f32 %v1412_v10, %v3640_v7  ;;  %v1526_v13 = vadd.f32 %v1525_v11, %v3640_v7 }
 0x184   : > { %v2420_v22 = vmax.f32 %v1411_v28, 0.0  ;;  %v2422_v14 = vmax.f32 %v1524_v9, 0.0 }
 0x185   : > { %v2421_v15 = vmax.f32 %v1413_v0, 0.0  ;;  %v2423_v16 = vmax.f32 %v1526_v13, 0.0  ;;  %v1416_v18 = vpop.f32.mrb[78].mxu0  ;;  %v1529_v19 = vpop.f32.mrb[78].mxu1 }
 0x186   : > { %2676 = vst [vmem:[%s3554_s5 + $0x680] sm:$0xff] %v2420_v22  ;;  %2678 = vst [vmem:[%s3554_s5 + $0x690] sm:$0xff] %v2422_v14  ;;  %v1417_v29 = vadd.f32 %v1416_v18, %v3656_v21  ;;  %v1530_v20 = vadd.f32 %v1529_v19, %v3656_v21  ;;  %v1418_v23 = vpop.f32.mrb[79].mxu0  ;;  %v1531_v24 = vpop.f32.mrb[79].mxu1 }
 0x187   : > { %2677 = vst [vmem:[%s3554_s5 + $0x688] sm:$0xff] %v2421_v15  ;;  %2679 = vst [vmem:[%s3554_s5 + $0x698] sm:$0xff] %v2423_v16  ;;  %v1419_v31 = vadd.f32 %v1418_v23, %v3656_v21  ;;  %v1532_v32 = vadd.f32 %v1531_v24, %v3656_v21 }
 0x188   : > { %v2452_v33 = vmax.f32 %v1417_v29, 0.0  ;;  %v2454_v25 = vmax.f32 %v1530_v20, 0.0 }
 0x189   : > { %v2453_v34 = vmax.f32 %v1419_v31, 0.0  ;;  %v2455_v35 = vmax.f32 %v1532_v32, 0.0  ;;  %v1600_v36 = vpop.f32.mrb[80].mxu0  ;;  %v1713_v37 = vpop.f32.mrb[80].mxu1 }
 0x18a   : > { %2708 = vst [vmem:[%s3554_s5 + $0x780] sm:$0xff] %v2452_v33  ;;  %2710 = vst [vmem:[%s3554_s5 + $0x790] sm:$0xff] %v2454_v25  ;;  %v1601_v38 = vadd.f32 %v1600_v36, %v3536_v50  ;;  %v1714_v39 = vadd.f32 %v1713_v37, %v3536_v50  ;;  %v1602_v40 = vpop.f32.mrb[81].mxu0  ;;  %v1715_v41 = vpop.f32.mrb[81].mxu1 }
 0x18b   : > { %2709 = vst [vmem:[%s3554_s5 + $0x788] sm:$0xff] %v2453_v34  ;;  %2711 = vst [vmem:[%s3554_s5 + $0x798] sm:$0xff] %v2455_v35  ;;  %v1603_v42 = vadd.f32 %v1602_v40, %v3536_v50  ;;  %v1716_v44 = vadd.f32 %v1715_v41, %v3536_v50 }
 0x18c   : > { %v2232_v45 = vmax.f32 %v1601_v38, 0.0  ;;  %v2234_v46 = vmax.f32 %v1714_v39, 0.0 }
 0x18d   : > { %v2233_v26 = vmax.f32 %v1603_v42, 0.0  ;;  %v2235_v47 = vmax.f32 %v1716_v44, 0.0  ;;  %v1606_v48 = vpop.f32.mrb[82].mxu0  ;;  %v1719_v12 = vpop.f32.mrb[82].mxu1 }
 0x18e   : > { %2488 = vst [vmem:[%s3554_s5 + $0xa0] sm:$0xff] %v2232_v45  ;;  %2490 = vst [vmem:[%s3554_s5 + $0xb0] sm:$0xff] %v2234_v46  ;;  %v1607_v49 = vadd.f32 %v1606_v48, %v3560_v59  ;;  %v1720_v51 = vadd.f32 %v1719_v12, %v3560_v59  ;;  %v1608_v52 = vpop.f32.mrb[83].mxu0  ;;  %v1721_v53 = vpop.f32.mrb[83].mxu1 }
 0x18f   : > { %2489 = vst [vmem:[%s3554_s5 + $0xa8] sm:$0xff] %v2233_v26  ;;  %2491 = vst [vmem:[%s3554_s5 + $0xb8] sm:$0xff] %v2235_v47  ;;  %v1609_v54 = vadd.f32 %v1608_v52, %v3560_v59  ;;  %v1722_v55 = vadd.f32 %v1721_v53, %v3560_v59 }
 0x190   : > { %v2264_v57 = vmax.f32 %v1607_v49, 0.0  ;;  %v2266_v58 = vmax.f32 %v1720_v51, 0.0 }
 0x191   : > { %v2265_v27 = vmax.f32 %v1609_v54, 0.0  ;;  %v2267_v60 = vmax.f32 %v1722_v55, 0.0  ;;  %v1612_v61 = vpop.f32.mrb[84].mxu0  ;;  %v1725_v63 = vpop.f32.mrb[84].mxu1 }
 0x192   : > { %2520 = vst [vmem:[%s3554_s5 + $0x1a0] sm:$0xff] %v2264_v57  ;;  %2522 = vst [vmem:[%s3554_s5 + $0x1b0] sm:$0xff] %v2266_v58  ;;  %v1613_v17 = vadd.f32 %v1612_v61, %v3562_v62  ;;  %v1726_v1 = vadd.f32 %v1725_v63, %v3562_v62  ;;  %v1614_v2 = vpop.f32.mrb[85].mxu0  ;;  %v1727_v3 = vpop.f32.mrb[85].mxu1 }
 0x193   : > { %2521 = vst [vmem:[%s3554_s5 + $0x1a8] sm:$0xff] %v2265_v27  ;;  %2523 = vst [vmem:[%s3554_s5 + $0x1b8] sm:$0xff] %v2267_v60  ;;  %v1615_v4 = vadd.f32 %v1614_v2, %v3562_v62  ;;  %v1728_v5 = vadd.f32 %v1727_v3, %v3562_v62 }
 0x194   : > { %v2296_v6 = vmax.f32 %v1613_v17, 0.0  ;;  %v2298_v8 = vmax.f32 %v1726_v1, 0.0 }
 0x195   : > { %v2297_v28 = vmax.f32 %v1615_v4, 0.0  ;;  %v2299_v9 = vmax.f32 %v1728_v5, 0.0  ;;  %v1618_v10 = vpop.f32.mrb[86].mxu0  ;;  %v1731_v11 = vpop.f32.mrb[86].mxu1 }
 0x196   : > { %2552 = vst [vmem:[%s3554_s5 + $0x2a0] sm:$0xff] %v2296_v6  ;;  %2554 = vst [vmem:[%s3554_s5 + $0x2b0] sm:$0xff] %v2298_v8  ;;  %v1619_v0 = vadd.f32 %v1618_v10, %v3592_v30  ;;  %v1732_v13 = vadd.f32 %v1731_v11, %v3592_v30  ;;  %v1620_v22 = vpop.f32.mrb[87].mxu0  ;;  %v1733_v14 = vpop.f32.mrb[87].mxu1 }
 0x197   : > { %2553 = vst [vmem:[%s3554_s5 + $0x2a8] sm:$0xff] %v2297_v28  ;;  %2555 = vst [vmem:[%s3554_s5 + $0x2b8] sm:$0xff] %v2299_v9  ;;  %v1621_v15 = vadd.f32 %v1620_v22, %v3592_v30  ;;  %v1734_v16 = vadd.f32 %v1733_v14, %v3592_v30 }
 0x198   : > { %v2328_v18 = vmax.f32 %v1619_v0, 0.0  ;;  %v2330_v19 = vmax.f32 %v1732_v13, 0.0 }
 0x199   : > { %v2329_v29 = vmax.f32 %v1621_v15, 0.0  ;;  %v2331_v20 = vmax.f32 %v1734_v16, 0.0  ;;  %v1624_v23 = vpop.f32.mrb[88].mxu0  ;;  %v1737_v24 = vpop.f32.mrb[88].mxu1 }
 0x19a   : > { %2584 = vst [vmem:[%s3554_s5 + $0x3a0] sm:$0xff] %v2328_v18  ;;  %2586 = vst [vmem:[%s3554_s5 + $0x3b0] sm:$0xff] %v2330_v19  ;;  %v1625_v31 = vadd.f32 %v1624_v23, %v3608_v43  ;;  %v1738_v32 = vadd.f32 %v1737_v24, %v3608_v43  ;;  %v1626_v33 = vpop.f32.mrb[89].mxu0  ;;  %v1739_v25 = vpop.f32.mrb[89].mxu1 }
 0x19b   : > { %2585 = vst [vmem:[%s3554_s5 + $0x3a8] sm:$0xff] %v2329_v29  ;;  %2587 = vst [vmem:[%s3554_s5 + $0x3b8] sm:$0xff] %v2331_v20  ;;  %v1627_v34 = vadd.f32 %v1626_v33, %v3608_v43  ;;  %v1740_v35 = vadd.f32 %v1739_v25, %v3608_v43 }
 0x19c   : > { %v2360_v36 = vmax.f32 %v1625_v31, 0.0  ;;  %v2362_v37 = vmax.f32 %v1738_v32, 0.0 }
 0x19d   : > { %v2361_v38 = vmax.f32 %v1627_v34, 0.0  ;;  %v2363_v39 = vmax.f32 %v1740_v35, 0.0  ;;  %v1630_v40 = vpop.f32.mrb[90].mxu0  ;;  %v1743_v41 = vpop.f32.mrb[90].mxu1 }
 0x19e   : > { %2616 = vst [vmem:[%s3554_s5 + $0x4a0] sm:$0xff] %v2360_v36  ;;  %2618 = vst [vmem:[%s3554_s5 + $0x4b0] sm:$0xff] %v2362_v37  ;;  %v1631_v42 = vadd.f32 %v1630_v40, %v3624_v56  ;;  %v1744_v44 = vadd.f32 %v1743_v41, %v3624_v56  ;;  %v1632_v45 = vpop.f32.mrb[91].mxu0  ;;  %v1745_v46 = vpop.f32.mrb[91].mxu1 }
 0x19f   : > { %2617 = vst [vmem:[%s3554_s5 + $0x4a8] sm:$0xff] %v2361_v38  ;;  %2619 = vst [vmem:[%s3554_s5 + $0x4b8] sm:$0xff] %v2363_v39  ;;  %v1633_v26 = vadd.f32 %v1632_v45, %v3624_v56  ;;  %v1746_v47 = vadd.f32 %v1745_v46, %v3624_v56 }
 0x1a0   : > { %v2392_v48 = vmax.f32 %v1631_v42, 0.0  ;;  %v2394_v12 = vmax.f32 %v1744_v44, 0.0 }
 0x1a1   : > { %v2393_v49 = vmax.f32 %v1633_v26, 0.0  ;;  %v2395_v51 = vmax.f32 %v1746_v47, 0.0  ;;  %v1636_v52 = vpop.f32.mrb[92].mxu0  ;;  %v1749_v53 = vpop.f32.mrb[92].mxu1 }
 0x1a2   : > { %2648 = vst [vmem:[%s3554_s5 + $0x5a0] sm:$0xff] %v2392_v48  ;;  %2650 = vst [vmem:[%s3554_s5 + $0x5b0] sm:$0xff] %v2394_v12  ;;  %v1637_v54 = vadd.f32 %v1636_v52, %v3640_v7  ;;  %v1750_v55 = vadd.f32 %v1749_v53, %v3640_v7  ;;  %v1638_v57 = vpop.f32.mrb[93].mxu0  ;;  %v1751_v58 = vpop.f32.mrb[93].mxu1 }
 0x1a3   : > { %2649 = vst [vmem:[%s3554_s5 + $0x5a8] sm:$0xff] %v2393_v49  ;;  %2651 = vst [vmem:[%s3554_s5 + $0x5b8] sm:$0xff] %v2395_v51  ;;  %v1639_v27 = vadd.f32 %v1638_v57, %v3640_v7  ;;  %v1752_v60 = vadd.f32 %v1751_v58, %v3640_v7 }
 0x1a4   : > { %v2424_v61 = vmax.f32 %v1637_v54, 0.0  ;;  %v2426_v63 = vmax.f32 %v1750_v55, 0.0 }
 0x1a5   : > { %v2425_v17 = vmax.f32 %v1639_v27, 0.0  ;;  %v2427_v1 = vmax.f32 %v1752_v60, 0.0  ;;  %v1642_v2 = vpop.f32.mrb[94].mxu0  ;;  %v1755_v3 = vpop.f32.mrb[94].mxu1 }
 0x1a6   : > { %2680 = vst [vmem:[%s3554_s5 + $0x6a0] sm:$0xff] %v2424_v61  ;;  %2682 = vst [vmem:[%s3554_s5 + $0x6b0] sm:$0xff] %v2426_v63  ;;  %v1643_v4 = vadd.f32 %v1642_v2, %v3656_v21  ;;  %v1756_v5 = vadd.f32 %v1755_v3, %v3656_v21  ;;  %v1644_v6 = vpop.f32.mrb[95].mxu0  ;;  %v1757_v8 = vpop.f32.mrb[95].mxu1 }
 0x1a7   : > { %2681 = vst [vmem:[%s3554_s5 + $0x6a8] sm:$0xff] %v2425_v17  ;;  %2683 = vst [vmem:[%s3554_s5 + $0x6b8] sm:$0xff] %v2427_v1  ;;  %v1645_v28 = vadd.f32 %v1644_v6, %v3656_v21  ;;  %v1758_v9 = vadd.f32 %v1757_v8, %v3656_v21 }
 0x1a8   : > { %v2456_v10 = vmax.f32 %v1643_v4, 0.0  ;;  %v2458_v11 = vmax.f32 %v1756_v5, 0.0 }
 0x1a9   : > { %v2457_v0 = vmax.f32 %v1645_v28, 0.0  ;;  %v2459_v13 = vmax.f32 %v1758_v9, 0.0  ;;  %v1826_v22 = vpop.f32.mrb[96].mxu0  ;;  %v1939_v14 = vpop.f32.mrb[96].mxu1 }
 0x1aa   : > { %2712 = vst [vmem:[%s3554_s5 + $0x7a0] sm:$0xff] %v2456_v10  ;;  %2714 = vst [vmem:[%s3554_s5 + $0x7b0] sm:$0xff] %v2458_v11  ;;  %v1827_v15 = vadd.f32 %v1826_v22, %v3536_v50  ;;  %v1940_v16 = vadd.f32 %v1939_v14, %v3536_v50  ;;  %v1828_v18 = vpop.f32.mrb[97].mxu0  ;;  %v1941_v19 = vpop.f32.mrb[97].mxu1 }
 0x1ab   : > { %2713 = vst [vmem:[%s3554_s5 + $0x7a8] sm:$0xff] %v2457_v0  ;;  %2715 = vst [vmem:[%s3554_s5 + $0x7b8] sm:$0xff] %v2459_v13  ;;  %v1829_v29 = vadd.f32 %v1828_v18, %v3536_v50  ;;  %v1942_v20 = vadd.f32 %v1941_v19, %v3536_v50 }
 0x1ac   : > { %v2236_v23 = vmax.f32 %v1827_v15, 0.0  ;;  %v2238_v24 = vmax.f32 %v1940_v16, 0.0 }
 0x1ad   : > { %v2237_v31 = vmax.f32 %v1829_v29, 0.0  ;;  %v2239_v32 = vmax.f32 %v1942_v20, 0.0  ;;  %v1832_v33 = vpop.f32.mrb[98].mxu0  ;;  %v1945_v25 = vpop.f32.mrb[98].mxu1 }
 0x1ae   : > { %2492 = vst [vmem:[%s3554_s5 + $0xc0] sm:$0xff] %v2236_v23  ;;  %2494 = vst [vmem:[%s3554_s5 + $0xd0] sm:$0xff] %v2238_v24  ;;  %v1833_v34 = vadd.f32 %v1832_v33, %v3560_v59  ;;  %v1946_v35 = vadd.f32 %v1945_v25, %v3560_v59  ;;  %v1834_v36 = vpop.f32.mrb[99].mxu0  ;;  %v1947_v37 = vpop.f32.mrb[99].mxu1 }
 0x1af   : > { %2493 = vst [vmem:[%s3554_s5 + $0xc8] sm:$0xff] %v2237_v31  ;;  %2495 = vst [vmem:[%s3554_s5 + $0xd8] sm:$0xff] %v2239_v32  ;;  %v1835_v38 = vadd.f32 %v1834_v36, %v3560_v59  ;;  %v1948_v39 = vadd.f32 %v1947_v37, %v3560_v59 }
 0x1b0   : > { %v2268_v40 = vmax.f32 %v1833_v34, 0.0  ;;  %v2270_v41 = vmax.f32 %v1946_v35, 0.0 }
 0x1b1   : > { %v2269_v42 = vmax.f32 %v1835_v38, 0.0  ;;  %v2271_v44 = vmax.f32 %v1948_v39, 0.0  ;;  %v1838_v45 = vpop.f32.mrb[100].mxu0  ;;  %v1951_v46 = vpop.f32.mrb[100].mxu1 }
 0x1b2   : > { %2524 = vst [vmem:[%s3554_s5 + $0x1c0] sm:$0xff] %v2268_v40  ;;  %2526 = vst [vmem:[%s3554_s5 + $0x1d0] sm:$0xff] %v2270_v41  ;;  %v1839_v26 = vadd.f32 %v1838_v45, %v3562_v62  ;;  %v1952_v47 = vadd.f32 %v1951_v46, %v3562_v62  ;;  %v1840_v48 = vpop.f32.mrb[101].mxu0  ;;  %v1953_v12 = vpop.f32.mrb[101].mxu1 }
 0x1b3   : > { %2525 = vst [vmem:[%s3554_s5 + $0x1c8] sm:$0xff] %v2269_v42  ;;  %2527 = vst [vmem:[%s3554_s5 + $0x1d8] sm:$0xff] %v2271_v44  ;;  %v1841_v49 = vadd.f32 %v1840_v48, %v3562_v62  ;;  %v1954_v51 = vadd.f32 %v1953_v12, %v3562_v62 }
 0x1b4   : > { %v2300_v52 = vmax.f32 %v1839_v26, 0.0  ;;  %v2302_v53 = vmax.f32 %v1952_v47, 0.0 }
 0x1b5   : > { %v2301_v54 = vmax.f32 %v1841_v49, 0.0  ;;  %v2303_v55 = vmax.f32 %v1954_v51, 0.0  ;;  %v1844_v57 = vpop.f32.mrb[102].mxu0  ;;  %v1957_v58 = vpop.f32.mrb[102].mxu1 }
 0x1b6   : > { %2556 = vst [vmem:[%s3554_s5 + $0x2c0] sm:$0xff] %v2300_v52  ;;  %2558 = vst [vmem:[%s3554_s5 + $0x2d0] sm:$0xff] %v2302_v53  ;;  %v1845_v27 = vadd.f32 %v1844_v57, %v3592_v30  ;;  %v1958_v60 = vadd.f32 %v1957_v58, %v3592_v30  ;;  %v1846_v61 = vpop.f32.mrb[103].mxu0  ;;  %v1959_v63 = vpop.f32.mrb[103].mxu1 }
 0x1b7   : > { %2557 = vst [vmem:[%s3554_s5 + $0x2c8] sm:$0xff] %v2301_v54  ;;  %2559 = vst [vmem:[%s3554_s5 + $0x2d8] sm:$0xff] %v2303_v55  ;;  %v1847_v17 = vadd.f32 %v1846_v61, %v3592_v30  ;;  %v1960_v1 = vadd.f32 %v1959_v63, %v3592_v30 }
 0x1b8   : > { %v2332_v2 = vmax.f32 %v1845_v27, 0.0  ;;  %v2334_v3 = vmax.f32 %v1958_v60, 0.0 }
 0x1b9   : > { %v2333_v4 = vmax.f32 %v1847_v17, 0.0  ;;  %v2335_v5 = vmax.f32 %v1960_v1, 0.0  ;;  %v1850_v6 = vpop.f32.mrb[104].mxu0  ;;  %v1963_v8 = vpop.f32.mrb[104].mxu1 }
 0x1ba   : > { %2588 = vst [vmem:[%s3554_s5 + $0x3c0] sm:$0xff] %v2332_v2  ;;  %2590 = vst [vmem:[%s3554_s5 + $0x3d0] sm:$0xff] %v2334_v3  ;;  %v1851_v28 = vadd.f32 %v1850_v6, %v3608_v43  ;;  %v1964_v9 = vadd.f32 %v1963_v8, %v3608_v43  ;;  %v1852_v10 = vpop.f32.mrb[105].mxu0  ;;  %v1965_v11 = vpop.f32.mrb[105].mxu1 }
 0x1bb   : > { %2589 = vst [vmem:[%s3554_s5 + $0x3c8] sm:$0xff] %v2333_v4  ;;  %2591 = vst [vmem:[%s3554_s5 + $0x3d8] sm:$0xff] %v2335_v5  ;;  %v1853_v0 = vadd.f32 %v1852_v10, %v3608_v43  ;;  %v1966_v13 = vadd.f32 %v1965_v11, %v3608_v43 }
 0x1bc   : > { %v2364_v22 = vmax.f32 %v1851_v28, 0.0  ;;  %v2366_v14 = vmax.f32 %v1964_v9, 0.0 }
 0x1bd   : > { %v2365_v15 = vmax.f32 %v1853_v0, 0.0  ;;  %v2367_v16 = vmax.f32 %v1966_v13, 0.0  ;;  %v1856_v18 = vpop.f32.mrb[106].mxu0  ;;  %v1969_v19 = vpop.f32.mrb[106].mxu1 }
 0x1be   : > { %2620 = vst [vmem:[%s3554_s5 + $0x4c0] sm:$0xff] %v2364_v22  ;;  %2622 = vst [vmem:[%s3554_s5 + $0x4d0] sm:$0xff] %v2366_v14  ;;  %v1857_v29 = vadd.f32 %v1856_v18, %v3624_v56  ;;  %v1970_v20 = vadd.f32 %v1969_v19, %v3624_v56  ;;  %v1858_v23 = vpop.f32.mrb[107].mxu0  ;;  %v1971_v24 = vpop.f32.mrb[107].mxu1 }
 0x1bf   : > { %2621 = vst [vmem:[%s3554_s5 + $0x4c8] sm:$0xff] %v2365_v15  ;;  %2623 = vst [vmem:[%s3554_s5 + $0x4d8] sm:$0xff] %v2367_v16  ;;  %v1859_v31 = vadd.f32 %v1858_v23, %v3624_v56  ;;  %v1972_v32 = vadd.f32 %v1971_v24, %v3624_v56 }
 0x1c0   : > { %v2396_v33 = vmax.f32 %v1857_v29, 0.0  ;;  %v2398_v25 = vmax.f32 %v1970_v20, 0.0 }
 0x1c1   : > { %v2397_v34 = vmax.f32 %v1859_v31, 0.0  ;;  %v2399_v35 = vmax.f32 %v1972_v32, 0.0  ;;  %v1862_v36 = vpop.f32.mrb[108].mxu0  ;;  %v1975_v37 = vpop.f32.mrb[108].mxu1 }
 0x1c2   : > { %2652 = vst [vmem:[%s3554_s5 + $0x5c0] sm:$0xff] %v2396_v33  ;;  %2654 = vst [vmem:[%s3554_s5 + $0x5d0] sm:$0xff] %v2398_v25  ;;  %v1863_v38 = vadd.f32 %v1862_v36, %v3640_v7  ;;  %v1976_v39 = vadd.f32 %v1975_v37, %v3640_v7  ;;  %v1864_v40 = vpop.f32.mrb[109].mxu0  ;;  %v1977_v41 = vpop.f32.mrb[109].mxu1 }
 0x1c3   : > { %2653 = vst [vmem:[%s3554_s5 + $0x5c8] sm:$0xff] %v2397_v34  ;;  %2655 = vst [vmem:[%s3554_s5 + $0x5d8] sm:$0xff] %v2399_v35  ;;  %v1865_v42 = vadd.f32 %v1864_v40, %v3640_v7  ;;  %v1978_v44 = vadd.f32 %v1977_v41, %v3640_v7 }
 0x1c4   : > { %v2428_v45 = vmax.f32 %v1863_v38, 0.0  ;;  %v2430_v46 = vmax.f32 %v1976_v39, 0.0 }
 0x1c5   : > { %v2429_v26 = vmax.f32 %v1865_v42, 0.0  ;;  %v2431_v47 = vmax.f32 %v1978_v44, 0.0  ;;  %v1868_v48 = vpop.f32.mrb[110].mxu0  ;;  %v1981_v12 = vpop.f32.mrb[110].mxu1 }
 0x1c6   : > { %2684 = vst [vmem:[%s3554_s5 + $0x6c0] sm:$0xff] %v2428_v45  ;;  %2686 = vst [vmem:[%s3554_s5 + $0x6d0] sm:$0xff] %v2430_v46  ;;  %v1869_v49 = vadd.f32 %v1868_v48, %v3656_v21  ;;  %v1982_v51 = vadd.f32 %v1981_v12, %v3656_v21  ;;  %v1870_v52 = vpop.f32.mrb[111].mxu0  ;;  %v1983_v53 = vpop.f32.mrb[111].mxu1 }
 0x1c7   : > { %2685 = vst [vmem:[%s3554_s5 + $0x6c8] sm:$0xff] %v2429_v26  ;;  %2687 = vst [vmem:[%s3554_s5 + $0x6d8] sm:$0xff] %v2431_v47  ;;  %v1871_v54 = vadd.f32 %v1870_v52, %v3656_v21  ;;  %v1984_v55 = vadd.f32 %v1983_v53, %v3656_v21 }
 0x1c8   : > { %v2460_v57 = vmax.f32 %v1869_v49, 0.0  ;;  %v2462_v58 = vmax.f32 %v1982_v51, 0.0 }
 0x1c9   : > { %v2461_v27 = vmax.f32 %v1871_v54, 0.0  ;;  %v2463_v60 = vmax.f32 %v1984_v55, 0.0  ;;  %v2052_v61 = vpop.f32.mrb[112].mxu0  ;;  %v2165_v63 = vpop.f32.mrb[112].mxu1 }
 0x1ca   : > { %2716 = vst [vmem:[%s3554_s5 + $0x7c0] sm:$0xff] %v2460_v57  ;;  %2718 = vst [vmem:[%s3554_s5 + $0x7d0] sm:$0xff] %v2462_v58  ;;  %v2053_v17 = vadd.f32 %v2052_v61, %v3536_v50  ;;  %v2166_v1 = vadd.f32 %v2165_v63, %v3536_v50  ;;  %v2054_v2 = vpop.f32.mrb[113].mxu0  ;;  %v2167_v3 = vpop.f32.mrb[113].mxu1 }
 0x1cb   : > { %2717 = vst [vmem:[%s3554_s5 + $0x7c8] sm:$0xff] %v2461_v27  ;;  %2719 = vst [vmem:[%s3554_s5 + $0x7d8] sm:$0xff] %v2463_v60  ;;  %v2055_v4 = vadd.f32 %v2054_v2, %v3536_v50  ;;  %v2168_v5 = vadd.f32 %v2167_v3, %v3536_v50 }
 0x1cc   : > { %v2240_v6 = vmax.f32 %v2053_v17, 0.0  ;;  %v2242_v8 = vmax.f32 %v2166_v1, 0.0 }
 0x1cd   : > { %v2241_v28 = vmax.f32 %v2055_v4, 0.0  ;;  %v2243_v9 = vmax.f32 %v2168_v5, 0.0  ;;  %v2058_v10 = vpop.f32.mrb[114].mxu0  ;;  %v2171_v11 = vpop.f32.mrb[114].mxu1 }
 0x1ce   : > { %2496 = vst [vmem:[%s3554_s5 + $0xe0] sm:$0xff] %v2240_v6  ;;  %2498 = vst [vmem:[%s3554_s5 + $0xf0] sm:$0xff] %v2242_v8  ;;  %v2059_v0 = vadd.f32 %v2058_v10, %v3560_v59  ;;  %v2172_v13 = vadd.f32 %v2171_v11, %v3560_v59  ;;  %v2060_v22 = vpop.f32.mrb[115].mxu0  ;;  %v2173_v14 = vpop.f32.mrb[115].mxu1 }
 0x1cf   : > { %2497 = vst [vmem:[%s3554_s5 + $0xe8] sm:$0xff] %v2241_v28  ;;  %2499 = vst [vmem:[%s3554_s5 + $0xf8] sm:$0xff] %v2243_v9  ;;  %v2061_v50 = vadd.f32 %v2060_v22, %v3560_v59  ;;  %v2174_v15 = vadd.f32 %v2173_v14, %v3560_v59 }
 0x1d0   : > { %v2272_v16 = vmax.f32 %v2059_v0, 0.0  ;;  %v2274_v18 = vmax.f32 %v2172_v13, 0.0 }
 0x1d1   : > { %v2273_v19 = vmax.f32 %v2061_v50, 0.0  ;;  %v2275_v29 = vmax.f32 %v2174_v15, 0.0  ;;  %v2064_v20 = vpop.f32.mrb[116].mxu0  ;;  %v2177_v23 = vpop.f32.mrb[116].mxu1 }
 0x1d2   : > { %2528 = vst [vmem:[%s3554_s5 + $0x1e0] sm:$0xff] %v2272_v16  ;;  %2530 = vst [vmem:[%s3554_s5 + $0x1f0] sm:$0xff] %v2274_v18  ;;  %v2065_v24 = vadd.f32 %v2064_v20, %v3562_v62  ;;  %v2178_v31 = vadd.f32 %v2177_v23, %v3562_v62  ;;  %v2066_v32 = vpop.f32.mrb[117].mxu0  ;;  %v2179_v33 = vpop.f32.mrb[117].mxu1 }
 0x1d3   : > { %2529 = vst [vmem:[%s3554_s5 + $0x1e8] sm:$0xff] %v2273_v19  ;;  %2531 = vst [vmem:[%s3554_s5 + $0x1f8] sm:$0xff] %v2275_v29  ;;  %v2067_v59 = vadd.f32 %v2066_v32, %v3562_v62  ;;  %v2180_v25 = vadd.f32 %v2179_v33, %v3562_v62 }
 0x1d4   : > { %v2304_v34 = vmax.f32 %v2065_v24, 0.0  ;;  %v2306_v35 = vmax.f32 %v2178_v31, 0.0 }
 0x1d5   : > { %v2305_v36 = vmax.f32 %v2067_v59, 0.0  ;;  %v2307_v37 = vmax.f32 %v2180_v25, 0.0  ;;  %v2070_v38 = vpop.f32.mrb[118].mxu0  ;;  %v2183_v39 = vpop.f32.mrb[118].mxu1 }
 0x1d6   : > { %2560 = vst [vmem:[%s3554_s5 + $0x2e0] sm:$0xff] %v2304_v34  ;;  %2562 = vst [vmem:[%s3554_s5 + $0x2f0] sm:$0xff] %v2306_v35  ;;  %v2071_v40 = vadd.f32 %v2070_v38, %v3592_v30  ;;  %v2184_v41 = vadd.f32 %v2183_v39, %v3592_v30  ;;  %v2072_v42 = vpop.f32.mrb[119].mxu0  ;;  %v2185_v44 = vpop.f32.mrb[119].mxu1 }
 0x1d7   : > { %2561 = vst [vmem:[%s3554_s5 + $0x2e8] sm:$0xff] %v2305_v36  ;;  %2563 = vst [vmem:[%s3554_s5 + $0x2f8] sm:$0xff] %v2307_v37  ;;  %v2073_v62 = vadd.f32 %v2072_v42, %v3592_v30  ;;  %v2186_v45 = vadd.f32 %v2185_v44, %v3592_v30 }
 0x1d8   : > { %v2336_v46 = vmax.f32 %v2071_v40, 0.0  ;;  %v2338_v26 = vmax.f32 %v2184_v41, 0.0 }
 0x1d9   : > { %v2337_v47 = vmax.f32 %v2073_v62, 0.0  ;;  %v2339_v48 = vmax.f32 %v2186_v45, 0.0  ;;  %v2076_v12 = vpop.f32.mrb[120].mxu0  ;;  %v2189_v49 = vpop.f32.mrb[120].mxu1 }
 0x1da   : > { %2592 = vst [vmem:[%s3554_s5 + $0x3e0] sm:$0xff] %v2336_v46  ;;  %2594 = vst [vmem:[%s3554_s5 + $0x3f0] sm:$0xff] %v2338_v26  ;;  %v2077_v51 = vadd.f32 %v2076_v12, %v3608_v43  ;;  %v2190_v52 = vadd.f32 %v2189_v49, %v3608_v43  ;;  %v2078_v53 = vpop.f32.mrb[121].mxu0  ;;  %v2191_v54 = vpop.f32.mrb[121].mxu1 }
 0x1db   : > { %2593 = vst [vmem:[%s3554_s5 + $0x3e8] sm:$0xff] %v2337_v47  ;;  %2595 = vst [vmem:[%s3554_s5 + $0x3f8] sm:$0xff] %v2339_v48  ;;  %v2079_v30 = vadd.f32 %v2078_v53, %v3608_v43  ;;  %v2192_v55 = vadd.f32 %v2191_v54, %v3608_v43 }
 0x1dc   : > { %v2368_v57 = vmax.f32 %v2077_v51, 0.0  ;;  %v2370_v58 = vmax.f32 %v2190_v52, 0.0 }
 0x1dd   : > { %v2369_v27 = vmax.f32 %v2079_v30, 0.0  ;;  %v2371_v60 = vmax.f32 %v2192_v55, 0.0  ;;  %v2082_v61 = vpop.f32.mrb[122].mxu0  ;;  %v2195_v63 = vpop.f32.mrb[122].mxu1 }
 0x1de   : > { %2624 = vst [vmem:[%s3554_s5 + $0x4e0] sm:$0xff] %v2368_v57  ;;  %2626 = vst [vmem:[%s3554_s5 + $0x4f0] sm:$0xff] %v2370_v58  ;;  %v2083_v17 = vadd.f32 %v2082_v61, %v3624_v56  ;;  %v2196_v1 = vadd.f32 %v2195_v63, %v3624_v56  ;;  %v2084_v2 = vpop.f32.mrb[123].mxu0  ;;  %v2197_v3 = vpop.f32.mrb[123].mxu1 }
 0x1df   : > { %2625 = vst [vmem:[%s3554_s5 + $0x4e8] sm:$0xff] %v2369_v27  ;;  %2627 = vst [vmem:[%s3554_s5 + $0x4f8] sm:$0xff] %v2371_v60  ;;  %v2085_v43 = vadd.f32 %v2084_v2, %v3624_v56  ;;  %v2198_v4 = vadd.f32 %v2197_v3, %v3624_v56 }
 0x1e0   : > { %v2400_v5 = vmax.f32 %v2083_v17, 0.0  ;;  %v2402_v6 = vmax.f32 %v2196_v1, 0.0 }
 0x1e1   : > { %v2401_v8 = vmax.f32 %v2085_v43, 0.0  ;;  %v2403_v28 = vmax.f32 %v2198_v4, 0.0  ;;  %v2088_v9 = vpop.f32.mrb[124].mxu0  ;;  %v2201_v10 = vpop.f32.mrb[124].mxu1 }
 0x1e2   : > { %2656 = vst [vmem:[%s3554_s5 + $0x5e0] sm:$0xff] %v2400_v5  ;;  %2658 = vst [vmem:[%s3554_s5 + $0x5f0] sm:$0xff] %v2402_v6  ;;  %v2089_v11 = vadd.f32 %v2088_v9, %v3640_v7  ;;  %v2202_v0 = vadd.f32 %v2201_v10, %v3640_v7  ;;  %v2090_v13 = vpop.f32.mrb[125].mxu0  ;;  %v2203_v22 = vpop.f32.mrb[125].mxu1 }
 0x1e3   : > { %2657 = vst [vmem:[%s3554_s5 + $0x5e8] sm:$0xff] %v2401_v8  ;;  %2659 = vst [vmem:[%s3554_s5 + $0x5f8] sm:$0xff] %v2403_v28  ;;  %v2091_v56 = vadd.f32 %v2090_v13, %v3640_v7  ;;  %v2204_v14 = vadd.f32 %v2203_v22, %v3640_v7 }
 0x1e4   : > { %v2432_v50 = vmax.f32 %v2089_v11, 0.0  ;;  %v2434_v15 = vmax.f32 %v2202_v0, 0.0 }
 0x1e5   : > { %v2433_v16 = vmax.f32 %v2091_v56, 0.0  ;;  %v2435_v18 = vmax.f32 %v2204_v14, 0.0  ;;  %v2094_v19 = vpop.f32.mrb[126].mxu0  ;;  %v2207_v29 = vpop.f32.mrb[126].mxu1 }
 0x1e6   : > { %2688 = vst [vmem:[%s3554_s5 + $0x6e0] sm:$0xff] %v2432_v50  ;;  %2690 = vst [vmem:[%s3554_s5 + $0x6f0] sm:$0xff] %v2434_v15  ;;  %v2095_v20 = vadd.f32 %v2094_v19, %v3656_v21  ;;  %v2208_v23 = vadd.f32 %v2207_v29, %v3656_v21  ;;  %v2096_v24 = vpop.f32.mrb[127].mxu0  ;;  %v2209_v31 = vpop.f32.mrb[127].mxu1 }
 0x1e7   : > { %2689 = vst [vmem:[%s3554_s5 + $0x6e8] sm:$0xff] %v2433_v16  ;;  %2691 = vst [vmem:[%s3554_s5 + $0x6f8] sm:$0xff] %v2435_v18  ;;  %v2097_v7 = vadd.f32 %v2096_v24, %v3656_v21  ;;  %v2210_v32 = vadd.f32 %v2209_v31, %v3656_v21 }
 0x1e8   : > { %v2464_v33 = vmax.f32 %v2095_v20, 0.0  ;;  %v2466_v59 = vmax.f32 %v2208_v23, 0.0 }
 0x1e9   : > { %v2465_v25 = vmax.f32 %v2097_v7, 0.0  ;;  %v2467_v34 = vmax.f32 %v2210_v32, 0.0 }
 0x1ea   : > { %2720 = vst [vmem:[%s3554_s5 + $0x7e0] sm:$0xff] %v2464_v33  ;;  %2722 = vst [vmem:[%s3554_s5 + $0x7f0] sm:$0xff] %v2466_v59 }
 0x1eb   : > { %2721 = vst [vmem:[%s3554_s5 + $0x7e8] sm:$0xff] %v2465_v25  ;;  %2723 = vst [vmem:[%s3554_s5 + $0x7f8] sm:$0xff] %v2467_v34 }
 0x1ec PF: > { %s13_s14 = sadd.s32 1, %s3050_s14   ;;  %s4153_s12 = smov %s3046_s13 }
 0x1ed   : > { %p10_p5 = scmp.ge.s32.totalorder %s13_s14, 4   ;;  %s4154_s13 = smov %s4156_s15 }
 0x1ef   :  { %12 = sbr.rel (!%p10_p5) target bundleno = 2 (0x2), region = 62 }

</bundles_post_ra>
